<compile_context>
chip_gen: v7x
topology: tpu7x:2x2x1
jax: 0.10.0
libtpu: 0.0.40
codegen_flags: <defaults>
</compile_context>

<pallas_src>
import functools

import numpy as np
import jax
import jax.numpy as jnp
from jax.experimental import pallas as pl
from jax.experimental.pallas import tpu as pltpu


# --------------------------------------------------------------------------- #
# Small helpers
# --------------------------------------------------------------------------- #
def _ceil_to(x, m):
    return ((x + m - 1) // m) * m


def _mean_all(x):
    """Mean over all elements of a 2-D array, returned as a (1, 1) f32."""
    denom = float(x.shape[0] * x.shape[1])
    s = jnp.sum(x, axis=1, keepdims=True)     # [R, 1]
    s = jnp.sum(s, axis=0, keepdims=True)     # [1, 1]
    return s / denom


def _dot3(a, b):
    """Row-wise dot of two [B, 3] arrays via static lane slices (VPU only)."""
    return (a[:, 0:1] * b[:, 0:1]
            + a[:, 1:2] * b[:, 1:2]
            + a[:, 2:3] * b[:, 2:3])


def _f32(x):
    x = jnp.asarray(x)
    return x if x.dtype == jnp.float32 else x.astype(jnp.float32)


# --------------------------------------------------------------------------- #
# Kernel
# --------------------------------------------------------------------------- #
def _omad_loss_kernel(
    slab_ref,      # [R, W]  f32   single packed input slab
    out_ref,       # (1, 128) f32
    *,
    m_kp,          # M = B*P*K
    bn,            # B*N
    num_classes,
    batch,
    pack_width,
    row_gt_kp, row_logits, row_labels, row_pack,
    pack_offsets,
    num_parts,
    weights,
    joint_type,
    use_state_penalty,
):
    f32 = jnp.float32
    two_m = 2 * m_kp

    # ---------------- keypoint (location + shape) losses, vectorized --------
    pred = slab_ref[0:3, 0:two_m]                       # [3, 2M]
    gt = slab_ref[row_gt_kp:row_gt_kp + 3, 0:two_m]     # [3, 2M]
    d = pred - gt
    d2 = d * d
    sq = d2[0:1, :] + d2[1:2, :] + d2[2:3, :]           # [1, 2M] coord sum
    dist = jnp.sqrt(sq)                                 # [1, 2M]
    lane2m = jax.lax.broadcasted_iota(jnp.int32, (1, two_m), 1)
    loc_sum = jnp.sum(jnp.where(lane2m < m_kp, dist, 0.0), axis=-1, keepdims=True)
    tot_sum = jnp.sum(dist, axis=-1, keepdims=True)
    inv_m = 1.0 / float(m_kp)
    # mean over all (b, p, k) == mean over parts of per-part means (equal counts)
    loss_loc_mean = loc_sum * inv_m                     # (1, 1)
    loss_shape_mean = (tot_sum - loc_sum) * inv_m       # (1, 1)

    # ---------------- classification (cross-entropy), class dim unrolled ----
    logits = slab_ref[row_logits:row_logits + num_classes, 0:bn]   # [C, BN]
    labels = slab_ref[row_labels:row_labels + 1, 0:bn]             # [1, BN] f32
    mx = logits[0:1, :]
    for c in range(1, num_classes):
        mx = jnp.maximum(mx, logits[c:c + 1, :])
    sum_exp = jnp.zeros_like(mx)
    picked = jnp.zeros_like(mx)
    for c in range(num_classes):
        lc = logits[c:c + 1, :]
        sum_exp = sum_exp + jnp.exp(lc - mx)
        # NOTE: labels are exact small integers in f32; assumes labels in [0, C)
        # (out-of-range labels silently contribute 0, unlike torch CE).
        picked = picked + jnp.where(labels == float(c), lc, 0.0)
    ce = (mx + jnp.log(sum_exp)) - picked               # [1, BN]
    loss_cls = jnp.sum(ce, axis=-1, keepdims=True) * (1.0 / float(bn))

    # ---------------- small packed terms -------------------------------------
    pack = slab_ref[row_pack:row_pack + batch, 0:pack_width]       # [B, L]

    def take(name):
        off, sz = pack_offsets[name]
        return pack[:, off:off + sz]

    # Base transformation loss (part 0 only).
    bq = take('pred_base_quat')                         # [B, 4]
    gq = take('gt_base_quat')                           # [B, 4]
    dot_q = (bq[:, 0:1] * gq[:, 0:1] + bq[:, 1:2] * gq[:, 1:2]
             + bq[:, 2:3] * gq[:, 2:3] + bq[:, 3:4] * gq[:, 3:4])
    loss_base_r = _mean_all(1.0 - dot_q)
    dbt = take('pred_base_t') - take('gt_base_t')       # [B, 3]
    loss_base_t = _mean_all(jnp.sqrt(_dot3(dbt, dbt)))
    loss_base_all = loss_base_r + 0.5 * loss_base_t

    # Joint state loss, vectorized over joints.
    pjs = take('pred_joint_state')                      # [B, P-1]
    gjs = take('gt_joint_state')                        # [B, P-1] (gt[:, 1:])
    diff = pjs - gjs
    if use_state_penalty:
        diff = diff * jnp.where(pjs * gjs <= 0.0, 20.0, 1.0)
    loss_js_all = _mean_all(jnp.abs(diff))

    # Joint parameter loss (small static loop over the P-1 joints).
    num_joints = num_parts - 1
    eps = 1e-8
    pja = take('pred_joint_axis')                       # [B, 3*(P-1)]
    gja = take('gt_joint_axis')
    pjl = take('pred_joint_loc')
    gjl = take('gt_joint_loc')
    jp_sum = None
    for j in range(num_joints):
        s0, s1 = 3 * j, 3 * j + 3
        a_p = pja[:, s0:s1]                             # [B, 3]
        a_g = gja[:, s0:s1]
        n_p = jnp.sqrt(_dot3(a_p, a_p))
        n_g = jnp.sqrt(_dot3(a_g, a_g))
        cos = _dot3(a_p, a_g) / (jnp.maximum(n_p, eps) * jnp.maximum(n_g, eps))
        loss_axis = 1.0 - _mean_all(cos)
        if joint_type == 'revolute':
            # NOTE: reference divides by ||a_g|| and by (x.x) without eps; kept
            # as-is to match PyTorch semantics exactly (NaN if a_g == 0).
            norm_a_g = a_g / n_g
            pp = gjl[:, s0:s1]
            rr = pjl[:, s0:s1]
            qq = pp + norm_a_g
            x = pp - qq
            num = _dot3(rr - qq, x)
            den = _dot3(x, x)
            vec = num / den * (pp - qq) + (qq - rr)
            loss_loc_j = _mean_all(jnp.sqrt(_dot3(vec, vec)))
            jp_j = loss_loc_j + loss_axis
        else:  # prismatic
            jp_j = loss_axis
        jp_sum = jp_j if jp_sum is None else jp_sum + jp_j
    loss_jp_all = jp_sum * (1.0 / float(num_joints))

    # Regularization loss.
    beta = take('pred_beta')                            # [B, NB]
    loss_reg = _mean_all(beta * beta)

    # ---------------- total --------------------------------------------------
    w = weights
    loss_all = (w['loc'] * loss_loc_mean + w['shape'] * loss_shape_mean
                + w['base'] * loss_base_all
                + w['joint_state'] * loss_js_all
                + w['joint_param'] * loss_jp_all
                + w['cls'] * loss_cls
                + w['reg'] * loss_reg)

    # ---------------- single lane-dense store --------------------------------
    lane = jax.lax.broadcasted_iota(jnp.int32, (1, 128), 1)
    out = jnp.zeros((1, 128), f32)
    vals = (loss_all, loss_loc_mean, loss_shape_mean, loss_base_all,
            loss_js_all, loss_jp_all, loss_cls, loss_reg)
    for i, v in enumerate(vals):
        out = jnp.where(lane == i, v, out)
    out_ref[...] = out


# --------------------------------------------------------------------------- #
# Wrapper (jitted: packing + pallas_call + output slicing = one dispatch)
# --------------------------------------------------------------------------- #
@functools.partial(jax.jit, static_argnames=(
    'num_parts', 'joint_type', 'use_state_penalty',
    'loss_loc_weight', 'loss_cls_weight', 'loss_base_weight',
    'loss_joint_state_weight', 'loss_shape_weight',
    'loss_joint_param_weight', 'loss_reg_weight'))
def omad_loss_pallas(
    pred_trans_part_kp, dense_part_cls_score, pred_base_quat, pred_base_t,
    pred_norm_part_kp, pred_joint_loc, pred_joint_axis, pred_joint_state,
    pred_beta, gt_part_cls, gt_part_quat, gt_part_r, gt_part_t,
    gt_norm_part_kp, gt_joint_loc, gt_joint_axis, gt_joint_state,
    gt_tran_part_kp, *,
    num_parts, joint_type='revolute', use_state_penalty=True,
    loss_loc_weight=5.0, loss_cls_weight=1.0, loss_base_weight=0.2,
    loss_joint_state_weight=5.0, loss_shape_weight=3.0,
    loss_joint_param_weight=3.0, loss_reg_weight=0.01,
):
    """Mirrors Loss_OMAD_Net.forward; returns (loss_all, scores_all, loss_dict).

    All returned values are device scalars (no host syncs in this function).
    """
    # gt_part_r never enters any loss term in the PyTorch forward either.
    del gt_part_r
    assert joint_type in ('revolute', 'prismatic')
    assert num_parts >= 2

    B, P, K, _ = pred_trans_part_kp.shape
    assert P == num_parts
    # Equal keypoint count per part (guaranteed by the dense [B,P,K,3] layout);
    # required for mean-of-per-part-means == global mean of keypoint norms.
    assert pred_norm_part_kp.shape == pred_trans_part_kp.shape
    assert gt_tran_part_kp.shape == pred_trans_part_kp.shape
    assert gt_norm_part_kp.shape == pred_trans_part_kp.shape

    M = B * P * K
    N = dense_part_cls_score.shape[1]
    C = dense_part_cls_score.shape[2]
    BN = B * N

    # --- keypoints: lane-dense [3(coord), loc(M)|shape(M)] --------------------
    def kp_rows(loc_kp, shape_kp):
        loc = jnp.transpose(_f32(loc_kp), (3, 0, 1, 2)).reshape(3, M)
        shp = jnp.transpose(_f32(shape_kp), (3, 0, 1, 2)).reshape(3, M)
        return jnp.concatenate([loc, shp], axis=1)          # [3, 2M]

    pred_kp = kp_rows(pred_trans_part_kp, pred_norm_part_kp)
    gt_kp = kp_rows(gt_tran_part_kp, gt_norm_part_kp)

    # --- classification: lane-dense [C, B*N] logits + f32 labels row ----------
    logits_t = jnp.transpose(_f32(dense_part_cls_score), (2, 0, 1)).reshape(C, BN)
    labels_f = jnp.reshape(gt_part_cls, (1, BN)).astype(jnp.float32)

    # --- pack all tiny vectors into a single [B, L] block ---------------------
    pieces = [
        ('pred_base_quat', _f32(pred_base_quat)),                    # [B, 4]
        ('gt_base_quat', _f32(gt_part_quat[:, 0, :])),               # [B, 4]
        ('pred_base_t', _f32(pred_base_t)),                          # [B, 3]
        ('gt_base_t', _f32(gt_part_t[:, 0, 0, :])),                  # [B, 3]
        ('pred_joint_state', _f32(pred_joint_state)),                # [B, P-1]
        ('gt_joint_state', _f32(gt_joint_state[:, 1:])),             # [B, P-1]
        ('pred_joint_axis', _f32(pred_joint_axis).reshape(B, -1)),   # [B, 3(P-1)]
        ('gt_joint_axis', _f32(gt_joint_axis).reshape(B, -1)),
        ('pred_joint_loc', _f32(pred_joint_loc).reshape(B, -1)),
        ('gt_joint_loc', _f32(gt_joint_loc).reshape(B, -1)),
        ('pred_beta', _f32(pred_beta)),                              # [B, NB]
    ]
    offsets = {}
    off = 0
    for name, arr in pieces:
        offsets[name] = (off, int(arr.shape[1]))
        off += int(arr.shape[1])
    L = off
    pack = jnp.concatenate([arr for _, arr in pieces], axis=1)       # [B, L]

    # --- single input slab; every section starts on an 8-sublane boundary -----
    W = max(2 * M, BN, L)

    def put(arr, nrows):
        r, c = arr.shape
        return jnp.pad(arr, ((0, nrows - r), (0, W - c)))

    ROW_GT_KP = 8
    ROW_LOGITS = 16
    ROW_LABELS = ROW_LOGITS + _ceil_to(C, 8)
    ROW_PACK = ROW_LABELS + 8

    slab = jnp.concatenate([
        put(pred_kp, 8),
        put(gt_kp, 8),
        put(logits_t, _ceil_to(C, 8)),
        put(labels_f, 8),
        put(pack, B),
    ], axis=0)                                                       # [R, W]

    weights = dict(loc=loss_loc_weight, cls=loss_cls_weight, base=loss_base_weight,
                   joint_state=loss_joint_state_weight, shape=loss_shape_weight,
                   joint_param=loss_joint_param_weight, reg=loss_reg_weight)

    kern = functools.partial(
        _omad_loss_kernel, m_kp=M, bn=BN, num_classes=C, batch=B, pack_width=L,
        row_gt_kp=ROW_GT_KP, row_logits=ROW_LOGITS, row_labels=ROW_LABELS,
        row_pack=ROW_PACK, pack_offsets=offsets, num_parts=num_parts,
        weights=weights, joint_type=joint_type,
        use_state_penalty=use_state_penalty)

    n_joints = num_parts - 1
    cost = pl.CostEstimate(
        flops=int(20 * M + 8 * C * BN + 6 * BN + 80 * B * num_parts),
        transcendentals=int(C * BN + BN + 2 * M + B * (2 + 3 * n_joints)),
        bytes_accessed=int(slab.size * 4 + 128 * 4),
    )

    vmem = pl.BlockSpec(memory_space=pltpu.MemorySpace.VMEM)
    out = pl.pallas_call(
        kern,
        out_shape=jax.ShapeDtypeStruct((1, 128), jnp.float32),
        in_specs=[vmem],
        out_specs=vmem,
        compiler_params=pltpu.CompilerParams(allow_input_fusion=[True]),
        cost_estimate=cost,
    )(slab)

    # No host round-trips: return lazy device scalars (convert with float()
    # only when logging).
    loss_all = out[0, 0]
    scores_all = loss_all
    loss_dict = {
        'loss_loc': out[0, 1],
        'loss_shape': out[0, 2],
        'loss_base': out[0, 3],
        'loss_joint_state': out[0, 4],
        'loss_joint_param': out[0, 5],
        'loss_cls': out[0, 6],
        'loss_reg': out[0, 7],
    }
    return loss_all, scores_all, loss_dict


# --------------------------------------------------------------------------- #
# Pure-JAX reference (mirrors the PyTorch forward) for correctness checking
# --------------------------------------------------------------------------- #
def _reference_jnp(pred_trans_part_kp, dense_part_cls_score, pred_base_quat,
                   pred_base_t, pred_norm_part_kp, pred_joint_loc,
                   pred_joint_axis, pred_joint_state, pred_beta, gt_part_cls,
                   gt_part_quat, gt_part_t, gt_norm_part_kp, gt_joint_loc,
                   gt_joint_axis, gt_joint_state, gt_tran_part_kp, *,
                   num_parts, joint_type, use_state_penalty, w):
    losses, loc_l, shape_l, base_l, js_l, jp_l = [], [], [], [], [], []
    eps = 1e-8
    for p_idx in range(num_parts):
        dl = pred_trans_part_kp[:, p_idx] - gt_tran_part_kp[:, p_idx]
        loss_loc = jnp.mean(jnp.linalg.norm(dl, axis=-1))
        ds = pred_norm_part_kp[:, p_idx] - gt_norm_part_kp[:, p_idx]
        loss_shape = jnp.mean(jnp.linalg.norm(ds, axis=-1))
        loc_l.append(loss_loc)
        shape_l.append(loss_shape)
        if p_idx == 0:
            lbr = jnp.mean(1 - jnp.sum(pred_base_quat * gt_part_quat[:, 0], axis=-1))
            lbt = jnp.mean(jnp.linalg.norm(pred_base_t - gt_part_t[:, 0, 0], axis=-1))
            base_l.append(lbr + 0.5 * lbt)
        else:
            j = p_idx - 1
            pn = pred_joint_state[:, j] * gt_joint_state[:, p_idx]
            diff = pred_joint_state[:, j] - gt_joint_state[:, p_idx]
            pen = (jnp.where(pn <= 0, 20.0, 1.0) if use_state_penalty
                   else jnp.ones_like(diff))
            js_l.append(jnp.mean(jnp.abs(diff * pen)))
            a_p, a_g = pred_joint_axis[:, j], gt_joint_axis[:, j]
            cos = jnp.sum(a_p * a_g, -1) / (
                jnp.maximum(jnp.linalg.norm(a_p, axis=-1), eps)
                * jnp.maximum(jnp.linalg.norm(a_g, axis=-1), eps))
            la = 1 - jnp.mean(cos)
            if joint_type == 'revolute':
                nag = a_g / jnp.linalg.norm(a_g, axis=-1, keepdims=True)
                p_ = gt_joint_loc[:, j]
                q_ = p_ + nag
                r_ = pred_joint_loc[:, j]
                x = p_ - q_
                vec = (jnp.sum((r_ - q_) * x, -1, keepdims=True)
                       / jnp.sum(x * x, -1, keepdims=True) * (p_ - q_) + (q_ - r_))
                jp_l.append(jnp.mean(jnp.linalg.norm(vec, axis=-1)) + la)
            else:
                jp_l.append(la)
        losses.append(loss_loc * w['loc'] + loss_shape * w['shape'])
    loss_all = jnp.mean(jnp.stack(losses))
    loss_base_all = jnp.mean(jnp.stack(base_l))
    loss_js_all = jnp.mean(jnp.stack(js_l))
    loss_jp_all = jnp.mean(jnp.stack(jp_l))
    loss_all = loss_all + w['base'] * loss_base_all
    loss_all = loss_all + w['joint_state'] * loss_js_all
    loss_all = loss_all + w['joint_param'] * loss_jp_all
    logits = dense_part_cls_score.reshape(-1, dense_part_cls_score.shape[-1])
    lab = gt_part_cls.reshape(-1)
    lse = jax.nn.logsumexp(logits, axis=-1)
    picked = jnp.take_along_axis(logits, lab[:, None], axis=-1)[:, 0]
    loss_cls = jnp.mean(lse - picked)
    loss_all = loss_all + w['cls'] * loss_cls
    loss_reg = jnp.mean(pred_beta * pred_beta)
    loss_all = loss_all + w['reg'] * loss_reg
    ref_dict = dict(loss_loc=jnp.mean(jnp.stack(loc_l)),
                    loss_shape=jnp.mean(jnp.stack(shape_l)),
                    loss_base=loss_base_all, loss_joint_state=loss_js_all,
                    loss_joint_param=loss_jp_all, loss_cls=loss_cls,
                    loss_reg=loss_reg)
    return loss_all, ref_dict


# --------------------------------------------------------------------------- #
# Demo / self-test
# --------------------------------------------------------------------------- #
if __name__ == "__main__":
    key = jax.random.PRNGKey(0)
    B = 2            # batch
    P = 3            # num_parts
    K = 8            # num_key_per_part
    NPT = 64         # dense points per sample
    NB = 10          # beta (shape-basis) dimension
    C = P            # num_classes (use_background=False)

    ks = jax.random.split(key, 18)
    f = jnp.float32

    pred_trans_part_kp = jax.random.normal(ks[0], (B, P, K, 3), f)
    dense_part_cls_score = jax.random.normal(ks[1], (B, NPT, C), f)
    pred_base_quat = jax.random.normal(ks[2], (B, 4), f)
    pred_base_quat = pred_base_quat / jnp.linalg.norm(pred_base_quat, axis=-1, keepdims=True)
    pred_base_t = jax.random.normal(ks[3], (B, 3), f)
    pred_norm_part_kp = jax.random.normal(ks[4], (B, P, K, 3), f)
    pred_joint_loc = jax.random.normal(ks[5], (B, P - 1, 3), f)
    pred_joint_axis = jax.random.normal(ks[6], (B, P - 1, 3), f)
    pred_joint_state = jax.random.normal(ks[7], (B, P - 1), f)
    pred_beta = jax.random.normal(ks[8], (B, NB), f)
    gt_part_cls = jax.random.randint(ks[9], (B, NPT), 0, C, jnp.int32)
    gt_part_quat = jax.random.normal(ks[10], (B, P, 4), f)
    gt_part_quat = gt_part_quat / jnp.linalg.norm(gt_part_quat, axis=-1, keepdims=True)
    gt_part_r = jax.random.normal(ks[11], (B, P, 3, 3), f)
    gt_part_t = jax.random.normal(ks[12], (B, P, 1, 3), f)
    gt_norm_part_kp = jax.random.normal(ks[13], (B, P, K, 3), f)
    gt_joint_loc = jax.random.normal(ks[14], (B, P - 1, 3), f)
    gt_joint_axis = jax.random.normal(ks[15], (B, P - 1, 3), f)
    gt_joint_state = jax.random.normal(ks[16], (B, P), f)
    gt_tran_part_kp = jax.random.normal(ks[17], (B, P, K, 3), f)

    loss_all, scores_all, loss_dict = omad_loss_pallas(
        pred_trans_part_kp, dense_part_cls_score, pred_base_quat, pred_base_t,
        pred_norm_part_kp, pred_joint_loc, pred_joint_axis, pred_joint_state,
        pred_beta, gt_part_cls, gt_part_quat, gt_part_r, gt_part_t,
        gt_norm_part_kp, gt_joint_loc, gt_joint_axis, gt_joint_state,
        gt_tran_part_kp,
        num_parts=P, joint_type='revolute', use_state_penalty=True)
    jax.block_until_ready(loss_all)

    # Correctness check against a pure-JAX mirror of the PyTorch forward.
    w = dict(loc=5.0, cls=1.0, base=0.2, joint_state=5.0, shape=3.0,
             joint_param=3.0, reg=0.01)
    ref_all, ref_dict = _reference_jnp(
        pred_trans_part_kp, dense_part_cls_score, pred_base_quat, pred_base_t,
        pred_norm_part_kp, pred_joint_loc, pred_joint_axis, pred_joint_state,
        pred_beta, gt_part_cls, gt_part_quat, gt_part_t, gt_norm_part_kp,
        gt_joint_loc, gt_joint_axis, gt_joint_state, gt_tran_part_kp,
        num_parts=P, joint_type='revolute', use_state_penalty=True, w=w)
    np.testing.assert_allclose(np.asarray(loss_all), np.asarray(ref_all),
                               rtol=1e-4, atol=1e-5)
    for name in ref_dict:
        np.testing.assert_allclose(np.asarray(loss_dict[name]),
                                   np.asarray(ref_dict[name]),
                                   rtol=1e-4, atol=1e-5)

    print("KERNEL_OK")
</pallas_src>

<mosaic_0001>
module attributes {stable_mosaic.version = 11 : i64} {
  func.func @_omad_loss_kernel(%arg0: memref<34x128xf32, #tpu.memory_space<vmem>>, %arg1: memref<1x128xf32, #tpu.memory_space<vmem>>) attributes {dimension_semantics = [], scalar_prefetch = 0 : i64, scratch_operands = 0 : i64, tpu.core_type = #tpu.core_type<tc>} {
    %c0 = arith.constant 0 : index
    %c0_0 = arith.constant 0 : index
    %0 = vector.load %arg0[%c0, %c0_0] : memref<34x128xf32, #tpu.memory_space<vmem>>, vector<3x96xf32>
    %c8 = arith.constant 8 : index
    %c0_1 = arith.constant 0 : index
    %1 = vector.load %arg0[%c8, %c0_1] : memref<34x128xf32, #tpu.memory_space<vmem>>, vector<3x96xf32>
    %2 = arith.subf %0, %1 : vector<3x96xf32>
    %3 = arith.mulf %2, %2 : vector<3x96xf32>
    %4 = vector.extract_strided_slice %3 {offsets = [0, 0], sizes = [1, 96], strides = [1, 1]} : vector<3x96xf32> to vector<1x96xf32>
    %5 = vector.extract_strided_slice %3 {offsets = [1, 0], sizes = [1, 96], strides = [1, 1]} : vector<3x96xf32> to vector<1x96xf32>
    %6 = arith.addf %4, %5 : vector<1x96xf32>
    %7 = vector.extract_strided_slice %3 {offsets = [2, 0], sizes = [1, 96], strides = [1, 1]} : vector<3x96xf32> to vector<1x96xf32>
    %8 = arith.addf %6, %7 : vector<1x96xf32>
    %9 = math.sqrt %8 : vector<1x96xf32>
    %10 = tpu.iota {dimensions = array<i32: 1>} : vector<1x96xi32>
    %c48_i32 = arith.constant 48 : i32
    %11 = vector.broadcast %c48_i32 : i32 to vector<1x96xi32>
    %12 = arith.cmpi slt, %10, %11 : vector<1x96xi32>
    %cst = arith.constant 0.000000e+00 : f32
    %13 = vector.broadcast %cst : f32 to vector<1x96xf32>
    %14 = arith.select %12, %9, %13 : vector<1x96xi1>, vector<1x96xf32>
    %cst_2 = arith.constant dense<0.000000e+00> : vector<1xf32>
    %15 = vector.multi_reduction <add>, %14, %cst_2 [1] : vector<1x96xf32> to vector<1xf32>
    %16 = vector.shape_cast %15 : vector<1xf32> to vector<1x1xf32>
    %cst_3 = arith.constant dense<0.000000e+00> : vector<1xf32>
    %17 = vector.multi_reduction <add>, %9, %cst_3 [1] : vector<1x96xf32> to vector<1xf32>
    %18 = vector.shape_cast %17 : vector<1xf32> to vector<1x1xf32>
    %cst_4 = arith.constant 0.020833334 : f32
    %19 = vector.broadcast %cst_4 : f32 to vector<1x1xf32>
    %20 = arith.mulf %16, %19 : vector<1x1xf32>
    %21 = arith.subf %18, %16 : vector<1x1xf32>
    %cst_5 = arith.constant 0.020833334 : f32
    %22 = vector.broadcast %cst_5 : f32 to vector<1x1xf32>
    %23 = arith.mulf %21, %22 : vector<1x1xf32>
    %c16 = arith.constant 16 : index
    %c0_6 = arith.constant 0 : index
    %24 = vector.load %arg0[%c16, %c0_6] : memref<34x128xf32, #tpu.memory_space<vmem>>, vector<3x128xf32>
    %c24 = arith.constant 24 : index
    %c0_7 = arith.constant 0 : index
    %25 = vector.load %arg0[%c24, %c0_7] : memref<34x128xf32, #tpu.memory_space<vmem>>, vector<1x128xf32>
    %26 = vector.extract_strided_slice %24 {offsets = [0, 0], sizes = [1, 128], strides = [1, 1]} : vector<3x128xf32> to vector<1x128xf32>
    %27 = vector.extract_strided_slice %24 {offsets = [1, 0], sizes = [1, 128], strides = [1, 1]} : vector<3x128xf32> to vector<1x128xf32>
    %28 = arith.maximumf %26, %27 : vector<1x128xf32>
    %29 = vector.extract_strided_slice %24 {offsets = [2, 0], sizes = [1, 128], strides = [1, 1]} : vector<3x128xf32> to vector<1x128xf32>
    %30 = arith.maximumf %28, %29 : vector<1x128xf32>
    %cst_8 = arith.constant 0.000000e+00 : f32
    %31 = vector.broadcast %cst_8 : f32 to vector<1x128xf32>
    %cst_9 = arith.constant 0.000000e+00 : f32
    %32 = vector.broadcast %cst_9 : f32 to vector<1x128xf32>
    %33 = vector.extract_strided_slice %24 {offsets = [0, 0], sizes = [1, 128], strides = [1, 1]} : vector<3x128xf32> to vector<1x128xf32>
    %34 = arith.subf %33, %30 : vector<1x128xf32>
    %35 = math.exp %34 : vector<1x128xf32>
    %36 = arith.addf %31, %35 : vector<1x128xf32>
    %cst_10 = arith.constant 0.000000e+00 : f32
    %37 = vector.broadcast %cst_10 : f32 to vector<1x128xf32>
    %38 = arith.cmpf oeq, %25, %37 : vector<1x128xf32>
    %cst_11 = arith.constant 0.000000e+00 : f32
    %39 = vector.broadcast %cst_11 : f32 to vector<1x128xf32>
    %40 = arith.select %38, %33, %39 : vector<1x128xi1>, vector<1x128xf32>
    %41 = arith.addf %32, %40 : vector<1x128xf32>
    %42 = vector.extract_strided_slice %24 {offsets = [1, 0], sizes = [1, 128], strides = [1, 1]} : vector<3x128xf32> to vector<1x128xf32>
    %43 = arith.subf %42, %30 : vector<1x128xf32>
    %44 = math.exp %43 : vector<1x128xf32>
    %45 = arith.addf %36, %44 : vector<1x128xf32>
    %cst_12 = arith.constant 1.000000e+00 : f32
    %46 = vector.broadcast %cst_12 : f32 to vector<1x128xf32>
    %47 = arith.cmpf oeq, %25, %46 : vector<1x128xf32>
    %cst_13 = arith.constant 0.000000e+00 : f32
    %48 = vector.broadcast %cst_13 : f32 to vector<1x128xf32>
    %49 = arith.select %47, %42, %48 : vector<1x128xi1>, vector<1x128xf32>
    %50 = arith.addf %41, %49 : vector<1x128xf32>
    %51 = vector.extract_strided_slice %24 {offsets = [2, 0], sizes = [1, 128], strides = [1, 1]} : vector<3x128xf32> to vector<1x128xf32>
    %52 = arith.subf %51, %30 : vector<1x128xf32>
    %53 = math.exp %52 : vector<1x128xf32>
    %54 = arith.addf %45, %53 : vector<1x128xf32>
    %cst_14 = arith.constant 2.000000e+00 : f32
    %55 = vector.broadcast %cst_14 : f32 to vector<1x128xf32>
    %56 = arith.cmpf oeq, %25, %55 : vector<1x128xf32>
    %cst_15 = arith.constant 0.000000e+00 : f32
    %57 = vector.broadcast %cst_15 : f32 to vector<1x128xf32>
    %58 = arith.select %56, %51, %57 : vector<1x128xi1>, vector<1x128xf32>
    %59 = arith.addf %50, %58 : vector<1x128xf32>
    %60 = math.log %54 : vector<1x128xf32>
    %61 = arith.addf %30, %60 : vector<1x128xf32>
    %62 = arith.subf %61, %59 : vector<1x128xf32>
    %cst_16 = arith.constant dense<0.000000e+00> : vector<1xf32>
    %63 = vector.multi_reduction <add>, %62, %cst_16 [1] : vector<1x128xf32> to vector<1xf32>
    %64 = vector.shape_cast %63 : vector<1xf32> to vector<1x1xf32>
    %cst_17 = arith.constant 7.812500e-03 : f32
    %65 = vector.broadcast %cst_17 : f32 to vector<1x1xf32>
    %66 = arith.mulf %64, %65 : vector<1x1xf32>
    %c32 = arith.constant 32 : index
    %c0_18 = arith.constant 0 : index
    %67 = vector.load %arg0[%c32, %c0_18] : memref<34x128xf32, #tpu.memory_space<vmem>>, vector<2x52xf32>
    %68 = vector.extract_strided_slice %67 {offsets = [0, 0], sizes = [2, 4], strides = [1, 1]} : vector<2x52xf32> to vector<2x4xf32>
    %69 = vector.extract_strided_slice %67 {offsets = [0, 4], sizes = [2, 4], strides = [1, 1]} : vector<2x52xf32> to vector<2x4xf32>
    %70 = vector.extract_strided_slice %68 {offsets = [0, 0], sizes = [2, 1], strides = [1, 1]} : vector<2x4xf32> to vector<2x1xf32>
    %71 = vector.extract_strided_slice %69 {offsets = [0, 0], sizes = [2, 1], strides = [1, 1]} : vector<2x4xf32> to vector<2x1xf32>
    %72 = arith.mulf %70, %71 : vector<2x1xf32>
    %73 = vector.extract_strided_slice %68 {offsets = [0, 1], sizes = [2, 1], strides = [1, 1]} : vector<2x4xf32> to vector<2x1xf32>
    %74 = vector.extract_strided_slice %69 {offsets = [0, 1], sizes = [2, 1], strides = [1, 1]} : vector<2x4xf32> to vector<2x1xf32>
    %75 = arith.mulf %73, %74 : vector<2x1xf32>
    %76 = arith.addf %72, %75 : vector<2x1xf32>
    %77 = vector.extract_strided_slice %68 {offsets = [0, 2], sizes = [2, 1], strides = [1, 1]} : vector<2x4xf32> to vector<2x1xf32>
    %78 = vector.extract_strided_slice %69 {offsets = [0, 2], sizes = [2, 1], strides = [1, 1]} : vector<2x4xf32> to vector<2x1xf32>
    %79 = arith.mulf %77, %78 : vector<2x1xf32>
    %80 = arith.addf %76, %79 : vector<2x1xf32>
    %81 = vector.extract_strided_slice %68 {offsets = [0, 3], sizes = [2, 1], strides = [1, 1]} : vector<2x4xf32> to vector<2x1xf32>
    %82 = vector.extract_strided_slice %69 {offsets = [0, 3], sizes = [2, 1], strides = [1, 1]} : vector<2x4xf32> to vector<2x1xf32>
    %83 = arith.mulf %81, %82 : vector<2x1xf32>
    %84 = arith.addf %80, %83 : vector<2x1xf32>
    %cst_19 = arith.constant 1.000000e+00 : f32
    %85 = vector.broadcast %cst_19 : f32 to vector<2x1xf32>
    %86 = arith.subf %85, %84 : vector<2x1xf32>
    %cst_20 = arith.constant dense<0.000000e+00> : vector<2xf32>
    %87 = vector.multi_reduction <add>, %86, %cst_20 [1] : vector<2x1xf32> to vector<2xf32>
    %88 = vector.shape_cast %87 : vector<2xf32> to vector<2x1xf32>
    %cst_21 = arith.constant dense<0.000000e+00> : vector<1xf32>
    %89 = vector.multi_reduction <add>, %88, %cst_21 [0] : vector<2x1xf32> to vector<1xf32>
    %90 = vector.shape_cast %89 : vector<1xf32> to vector<1x1xf32>
    %cst_22 = arith.constant 2.000000e+00 : f32
    %91 = vector.broadcast %cst_22 : f32 to vector<1x1xf32>
    %92 = arith.divf %90, %91 : vector<1x1xf32>
    %93 = vector.extract_strided_slice %67 {offsets = [0, 8], sizes = [2, 3], strides = [1, 1]} : vector<2x52xf32> to vector<2x3xf32>
    %94 = vector.extract_strided_slice %67 {offsets = [0, 11], sizes = [2, 3], strides = [1, 1]} : vector<2x52xf32> to vector<2x3xf32>
    %95 = arith.subf %93, %94 : vector<2x3xf32>
    %96 = vector.extract_strided_slice %95 {offsets = [0, 0], sizes = [2, 1], strides = [1, 1]} : vector<2x3xf32> to vector<2x1xf32>
    %97 = vector.extract_strided_slice %95 {offsets = [0, 0], sizes = [2, 1], strides = [1, 1]} : vector<2x3xf32> to vector<2x1xf32>
    %98 = arith.mulf %96, %97 : vector<2x1xf32>
    %99 = vector.extract_strided_slice %95 {offsets = [0, 1], sizes = [2, 1], strides = [1, 1]} : vector<2x3xf32> to vector<2x1xf32>
    %100 = vector.extract_strided_slice %95 {offsets = [0, 1], sizes = [2, 1], strides = [1, 1]} : vector<2x3xf32> to vector<2x1xf32>
    %101 = arith.mulf %99, %100 : vector<2x1xf32>
    %102 = arith.addf %98, %101 : vector<2x1xf32>
    %103 = vector.extract_strided_slice %95 {offsets = [0, 2], sizes = [2, 1], strides = [1, 1]} : vector<2x3xf32> to vector<2x1xf32>
    %104 = vector.extract_strided_slice %95 {offsets = [0, 2], sizes = [2, 1], strides = [1, 1]} : vector<2x3xf32> to vector<2x1xf32>
    %105 = arith.mulf %103, %104 : vector<2x1xf32>
    %106 = arith.addf %102, %105 : vector<2x1xf32>
    %107 = math.sqrt %106 : vector<2x1xf32>
    %cst_23 = arith.constant dense<0.000000e+00> : vector<2xf32>
    %108 = vector.multi_reduction <add>, %107, %cst_23 [1] : vector<2x1xf32> to vector<2xf32>
    %109 = vector.shape_cast %108 : vector<2xf32> to vector<2x1xf32>
    %cst_24 = arith.constant dense<0.000000e+00> : vector<1xf32>
    %110 = vector.multi_reduction <add>, %109, %cst_24 [0] : vector<2x1xf32> to vector<1xf32>
    %111 = vector.shape_cast %110 : vector<1xf32> to vector<1x1xf32>
    %cst_25 = arith.constant 2.000000e+00 : f32
    %112 = vector.broadcast %cst_25 : f32 to vector<1x1xf32>
    %113 = arith.divf %111, %112 : vector<1x1xf32>
    %cst_26 = arith.constant 5.000000e-01 : f32
    %114 = vector.broadcast %cst_26 : f32 to vector<1x1xf32>
    %115 = arith.mulf %114, %113 : vector<1x1xf32>
    %116 = arith.addf %92, %115 : vector<1x1xf32>
    %117 = vector.extract_strided_slice %67 {offsets = [0, 14], sizes = [2, 2], strides = [1, 1]} : vector<2x52xf32> to vector<2x2xf32>
    %118 = vector.extract_strided_slice %67 {offsets = [0, 16], sizes = [2, 2], strides = [1, 1]} : vector<2x52xf32> to vector<2x2xf32>
    %119 = arith.subf %117, %118 : vector<2x2xf32>
    %120 = arith.mulf %117, %118 : vector<2x2xf32>
    %cst_27 = arith.constant 0.000000e+00 : f32
    %121 = vector.broadcast %cst_27 : f32 to vector<2x2xf32>
    %122 = arith.cmpf ole, %120, %121 : vector<2x2xf32>
    %cst_28 = arith.constant 2.000000e+01 : f32
    %cst_29 = arith.constant 1.000000e+00 : f32
    %123 = vector.broadcast %cst_28 : f32 to vector<2x2xf32>
    %124 = vector.broadcast %cst_29 : f32 to vector<2x2xf32>
    %125 = arith.select %122, %123, %124 : vector<2x2xi1>, vector<2x2xf32>
    %126 = arith.mulf %119, %125 : vector<2x2xf32>
    %127 = math.absf %126 : vector<2x2xf32>
    %cst_30 = arith.constant dense<0.000000e+00> : vector<2xf32>
    %128 = vector.multi_reduction <add>, %127, %cst_30 [1] : vector<2x2xf32> to vector<2xf32>
    %129 = vector.shape_cast %128 : vector<2xf32> to vector<2x1xf32>
    %cst_31 = arith.constant dense<0.000000e+00> : vector<1xf32>
    %130 = vector.multi_reduction <add>, %129, %cst_31 [0] : vector<2x1xf32> to vector<1xf32>
    %131 = vector.shape_cast %130 : vector<1xf32> to vector<1x1xf32>
    %cst_32 = arith.constant 4.000000e+00 : f32
    %132 = vector.broadcast %cst_32 : f32 to vector<1x1xf32>
    %133 = arith.divf %131, %132 : vector<1x1xf32>
    %134 = vector.extract_strided_slice %67 {offsets = [0, 18], sizes = [2, 6], strides = [1, 1]} : vector<2x52xf32> to vector<2x6xf32>
    %135 = vector.extract_strided_slice %67 {offsets = [0, 24], sizes = [2, 6], strides = [1, 1]} : vector<2x52xf32> to vector<2x6xf32>
    %136 = vector.extract_strided_slice %67 {offsets = [0, 30], sizes = [2, 6], strides = [1, 1]} : vector<2x52xf32> to vector<2x6xf32>
    %137 = vector.extract_strided_slice %67 {offsets = [0, 36], sizes = [2, 6], strides = [1, 1]} : vector<2x52xf32> to vector<2x6xf32>
    %138 = vector.extract_strided_slice %134 {offsets = [0, 0], sizes = [2, 3], strides = [1, 1]} : vector<2x6xf32> to vector<2x3xf32>
    %139 = vector.extract_strided_slice %135 {offsets = [0, 0], sizes = [2, 3], strides = [1, 1]} : vector<2x6xf32> to vector<2x3xf32>
    %140 = vector.extract_strided_slice %138 {offsets = [0, 0], sizes = [2, 1], strides = [1, 1]} : vector<2x3xf32> to vector<2x1xf32>
    %141 = vector.extract_strided_slice %138 {offsets = [0, 0], sizes = [2, 1], strides = [1, 1]} : vector<2x3xf32> to vector<2x1xf32>
    %142 = arith.mulf %140, %141 : vector<2x1xf32>
    %143 = vector.extract_strided_slice %138 {offsets = [0, 1], sizes = [2, 1], strides = [1, 1]} : vector<2x3xf32> to vector<2x1xf32>
    %144 = vector.extract_strided_slice %138 {offsets = [0, 1], sizes = [2, 1], strides = [1, 1]} : vector<2x3xf32> to vector<2x1xf32>
    %145 = arith.mulf %143, %144 : vector<2x1xf32>
    %146 = arith.addf %142, %145 : vector<2x1xf32>
    %147 = vector.extract_strided_slice %138 {offsets = [0, 2], sizes = [2, 1], strides = [1, 1]} : vector<2x3xf32> to vector<2x1xf32>
    %148 = vector.extract_strided_slice %138 {offsets = [0, 2], sizes = [2, 1], strides = [1, 1]} : vector<2x3xf32> to vector<2x1xf32>
    %149 = arith.mulf %147, %148 : vector<2x1xf32>
    %150 = arith.addf %146, %149 : vector<2x1xf32>
    %151 = math.sqrt %150 : vector<2x1xf32>
    %152 = vector.extract_strided_slice %139 {offsets = [0, 0], sizes = [2, 1], strides = [1, 1]} : vector<2x3xf32> to vector<2x1xf32>
    %153 = vector.extract_strided_slice %139 {offsets = [0, 0], sizes = [2, 1], strides = [1, 1]} : vector<2x3xf32> to vector<2x1xf32>
    %154 = arith.mulf %152, %153 : vector<2x1xf32>
    %155 = vector.extract_strided_slice %139 {offsets = [0, 1], sizes = [2, 1], strides = [1, 1]} : vector<2x3xf32> to vector<2x1xf32>
    %156 = vector.extract_strided_slice %139 {offsets = [0, 1], sizes = [2, 1], strides = [1, 1]} : vector<2x3xf32> to vector<2x1xf32>
    %157 = arith.mulf %155, %156 : vector<2x1xf32>
    %158 = arith.addf %154, %157 : vector<2x1xf32>
    %159 = vector.extract_strided_slice %139 {offsets = [0, 2], sizes = [2, 1], strides = [1, 1]} : vector<2x3xf32> to vector<2x1xf32>
    %160 = vector.extract_strided_slice %139 {offsets = [0, 2], sizes = [2, 1], strides = [1, 1]} : vector<2x3xf32> to vector<2x1xf32>
    %161 = arith.mulf %159, %160 : vector<2x1xf32>
    %162 = arith.addf %158, %161 : vector<2x1xf32>
    %163 = math.sqrt %162 : vector<2x1xf32>
    %164 = vector.extract_strided_slice %138 {offsets = [0, 0], sizes = [2, 1], strides = [1, 1]} : vector<2x3xf32> to vector<2x1xf32>
    %165 = vector.extract_strided_slice %139 {offsets = [0, 0], sizes = [2, 1], strides = [1, 1]} : vector<2x3xf32> to vector<2x1xf32>
    %166 = arith.mulf %164, %165 : vector<2x1xf32>
    %167 = vector.extract_strided_slice %138 {offsets = [0, 1], sizes = [2, 1], strides = [1, 1]} : vector<2x3xf32> to vector<2x1xf32>
    %168 = vector.extract_strided_slice %139 {offsets = [0, 1], sizes = [2, 1], strides = [1, 1]} : vector<2x3xf32> to vector<2x1xf32>
    %169 = arith.mulf %167, %168 : vector<2x1xf32>
    %170 = arith.addf %166, %169 : vector<2x1xf32>
    %171 = vector.extract_strided_slice %138 {offsets = [0, 2], sizes = [2, 1], strides = [1, 1]} : vector<2x3xf32> to vector<2x1xf32>
    %172 = vector.extract_strided_slice %139 {offsets = [0, 2], sizes = [2, 1], strides = [1, 1]} : vector<2x3xf32> to vector<2x1xf32>
    %173 = arith.mulf %171, %172 : vector<2x1xf32>
    %174 = arith.addf %170, %173 : vector<2x1xf32>
    %cst_33 = arith.constant 9.99999993E-9 : f32
    %175 = vector.broadcast %cst_33 : f32 to vector<2x1xf32>
    %176 = arith.maximumf %151, %175 : vector<2x1xf32>
    %cst_34 = arith.constant 9.99999993E-9 : f32
    %177 = vector.broadcast %cst_34 : f32 to vector<2x1xf32>
    %178 = arith.maximumf %163, %177 : vector<2x1xf32>
    %179 = arith.mulf %176, %178 : vector<2x1xf32>
    %180 = arith.divf %174, %179 : vector<2x1xf32>
    %cst_35 = arith.constant dense<0.000000e+00> : vector<2xf32>
    %181 = vector.multi_reduction <add>, %180, %cst_35 [1] : vector<2x1xf32> to vector<2xf32>
    %182 = vector.shape_cast %181 : vector<2xf32> to vector<2x1xf32>
    %cst_36 = arith.constant dense<0.000000e+00> : vector<1xf32>
    %183 = vector.multi_reduction <add>, %182, %cst_36 [0] : vector<2x1xf32> to vector<1xf32>
    %184 = vector.shape_cast %183 : vector<1xf32> to vector<1x1xf32>
    %cst_37 = arith.constant 2.000000e+00 : f32
    %185 = vector.broadcast %cst_37 : f32 to vector<1x1xf32>
    %186 = arith.divf %184, %185 : vector<1x1xf32>
    %cst_38 = arith.constant 1.000000e+00 : f32
    %187 = vector.broadcast %cst_38 : f32 to vector<1x1xf32>
    %188 = arith.subf %187, %186 : vector<1x1xf32>
    %189 = vector.broadcast %163 : vector<2x1xf32> to vector<2x3xf32>
    %190 = arith.divf %139, %189 : vector<2x3xf32>
    %191 = vector.extract_strided_slice %137 {offsets = [0, 0], sizes = [2, 3], strides = [1, 1]} : vector<2x6xf32> to vector<2x3xf32>
    %192 = vector.extract_strided_slice %136 {offsets = [0, 0], sizes = [2, 3], strides = [1, 1]} : vector<2x6xf32> to vector<2x3xf32>
    %193 = arith.addf %191, %190 : vector<2x3xf32>
    %194 = arith.subf %191, %193 : vector<2x3xf32>
    %195 = arith.subf %192, %193 : vector<2x3xf32>
    %196 = vector.extract_strided_slice %195 {offsets = [0, 0], sizes = [2, 1], strides = [1, 1]} : vector<2x3xf32> to vector<2x1xf32>
    %197 = vector.extract_strided_slice %194 {offsets = [0, 0], sizes = [2, 1], strides = [1, 1]} : vector<2x3xf32> to vector<2x1xf32>
    %198 = arith.mulf %196, %197 : vector<2x1xf32>
    %199 = vector.extract_strided_slice %195 {offsets = [0, 1], sizes = [2, 1], strides = [1, 1]} : vector<2x3xf32> to vector<2x1xf32>
    %200 = vector.extract_strided_slice %194 {offsets = [0, 1], sizes = [2, 1], strides = [1, 1]} : vector<2x3xf32> to vector<2x1xf32>
    %201 = arith.mulf %199, %200 : vector<2x1xf32>
    %202 = arith.addf %198, %201 : vector<2x1xf32>
    %203 = vector.extract_strided_slice %195 {offsets = [0, 2], sizes = [2, 1], strides = [1, 1]} : vector<2x3xf32> to vector<2x1xf32>
    %204 = vector.extract_strided_slice %194 {offsets = [0, 2], sizes = [2, 1], strides = [1, 1]} : vector<2x3xf32> to vector<2x1xf32>
    %205 = arith.mulf %203, %204 : vector<2x1xf32>
    %206 = arith.addf %202, %205 : vector<2x1xf32>
    %207 = vector.extract_strided_slice %194 {offsets = [0, 0], sizes = [2, 1], strides = [1, 1]} : vector<2x3xf32> to vector<2x1xf32>
    %208 = vector.extract_strided_slice %194 {offsets = [0, 0], sizes = [2, 1], strides = [1, 1]} : vector<2x3xf32> to vector<2x1xf32>
    %209 = arith.mulf %207, %208 : vector<2x1xf32>
    %210 = vector.extract_strided_slice %194 {offsets = [0, 1], sizes = [2, 1], strides = [1, 1]} : vector<2x3xf32> to vector<2x1xf32>
    %211 = vector.extract_strided_slice %194 {offsets = [0, 1], sizes = [2, 1], strides = [1, 1]} : vector<2x3xf32> to vector<2x1xf32>
    %212 = arith.mulf %210, %211 : vector<2x1xf32>
    %213 = arith.addf %209, %212 : vector<2x1xf32>
    %214 = vector.extract_strided_slice %194 {offsets = [0, 2], sizes = [2, 1], strides = [1, 1]} : vector<2x3xf32> to vector<2x1xf32>
    %215 = vector.extract_strided_slice %194 {offsets = [0, 2], sizes = [2, 1], strides = [1, 1]} : vector<2x3xf32> to vector<2x1xf32>
    %216 = arith.mulf %214, %215 : vector<2x1xf32>
    %217 = arith.addf %213, %216 : vector<2x1xf32>
    %218 = arith.divf %206, %217 : vector<2x1xf32>
    %219 = arith.subf %191, %193 : vector<2x3xf32>
    %220 = vector.broadcast %218 : vector<2x1xf32> to vector<2x3xf32>
    %221 = arith.mulf %220, %219 : vector<2x3xf32>
    %222 = arith.subf %193, %192 : vector<2x3xf32>
    %223 = arith.addf %221, %222 : vector<2x3xf32>
    %224 = vector.extract_strided_slice %223 {offsets = [0, 0], sizes = [2, 1], strides = [1, 1]} : vector<2x3xf32> to vector<2x1xf32>
    %225 = vector.extract_strided_slice %223 {offsets = [0, 0], sizes = [2, 1], strides = [1, 1]} : vector<2x3xf32> to vector<2x1xf32>
    %226 = arith.mulf %224, %225 : vector<2x1xf32>
    %227 = vector.extract_strided_slice %223 {offsets = [0, 1], sizes = [2, 1], strides = [1, 1]} : vector<2x3xf32> to vector<2x1xf32>
    %228 = vector.extract_strided_slice %223 {offsets = [0, 1], sizes = [2, 1], strides = [1, 1]} : vector<2x3xf32> to vector<2x1xf32>
    %229 = arith.mulf %227, %228 : vector<2x1xf32>
    %230 = arith.addf %226, %229 : vector<2x1xf32>
    %231 = vector.extract_strided_slice %223 {offsets = [0, 2], sizes = [2, 1], strides = [1, 1]} : vector<2x3xf32> to vector<2x1xf32>
    %232 = vector.extract_strided_slice %223 {offsets = [0, 2], sizes = [2, 1], strides = [1, 1]} : vector<2x3xf32> to vector<2x1xf32>
    %233 = arith.mulf %231, %232 : vector<2x1xf32>
    %234 = arith.addf %230, %233 : vector<2x1xf32>
    %235 = math.sqrt %234 : vector<2x1xf32>
    %cst_39 = arith.constant dense<0.000000e+00> : vector<2xf32>
    %236 = vector.multi_reduction <add>, %235, %cst_39 [1] : vector<2x1xf32> to vector<2xf32>
    %237 = vector.shape_cast %236 : vector<2xf32> to vector<2x1xf32>
    %cst_40 = arith.constant dense<0.000000e+00> : vector<1xf32>
    %238 = vector.multi_reduction <add>, %237, %cst_40 [0] : vector<2x1xf32> to vector<1xf32>
    %239 = vector.shape_cast %238 : vector<1xf32> to vector<1x1xf32>
    %cst_41 = arith.constant 2.000000e+00 : f32
    %240 = vector.broadcast %cst_41 : f32 to vector<1x1xf32>
    %241 = arith.divf %239, %240 : vector<1x1xf32>
    %242 = arith.addf %241, %188 : vector<1x1xf32>
    %243 = vector.extract_strided_slice %134 {offsets = [0, 3], sizes = [2, 3], strides = [1, 1]} : vector<2x6xf32> to vector<2x3xf32>
    %244 = vector.extract_strided_slice %135 {offsets = [0, 3], sizes = [2, 3], strides = [1, 1]} : vector<2x6xf32> to vector<2x3xf32>
    %245 = vector.extract_strided_slice %243 {offsets = [0, 0], sizes = [2, 1], strides = [1, 1]} : vector<2x3xf32> to vector<2x1xf32>
    %246 = vector.extract_strided_slice %243 {offsets = [0, 0], sizes = [2, 1], strides = [1, 1]} : vector<2x3xf32> to vector<2x1xf32>
    %247 = arith.mulf %245, %246 : vector<2x1xf32>
    %248 = vector.extract_strided_slice %243 {offsets = [0, 1], sizes = [2, 1], strides = [1, 1]} : vector<2x3xf32> to vector<2x1xf32>
    %249 = vector.extract_strided_slice %243 {offsets = [0, 1], sizes = [2, 1], strides = [1, 1]} : vector<2x3xf32> to vector<2x1xf32>
    %250 = arith.mulf %248, %249 : vector<2x1xf32>
    %251 = arith.addf %247, %250 : vector<2x1xf32>
    %252 = vector.extract_strided_slice %243 {offsets = [0, 2], sizes = [2, 1], strides = [1, 1]} : vector<2x3xf32> to vector<2x1xf32>
    %253 = vector.extract_strided_slice %243 {offsets = [0, 2], sizes = [2, 1], strides = [1, 1]} : vector<2x3xf32> to vector<2x1xf32>
    %254 = arith.mulf %252, %253 : vector<2x1xf32>
    %255 = arith.addf %251, %254 : vector<2x1xf32>
    %256 = math.sqrt %255 : vector<2x1xf32>
    %257 = vector.extract_strided_slice %244 {offsets = [0, 0], sizes = [2, 1], strides = [1, 1]} : vector<2x3xf32> to vector<2x1xf32>
    %258 = vector.extract_strided_slice %244 {offsets = [0, 0], sizes = [2, 1], strides = [1, 1]} : vector<2x3xf32> to vector<2x1xf32>
    %259 = arith.mulf %257, %258 : vector<2x1xf32>
    %260 = vector.extract_strided_slice %244 {offsets = [0, 1], sizes = [2, 1], strides = [1, 1]} : vector<2x3xf32> to vector<2x1xf32>
    %261 = vector.extract_strided_slice %244 {offsets = [0, 1], sizes = [2, 1], strides = [1, 1]} : vector<2x3xf32> to vector<2x1xf32>
    %262 = arith.mulf %260, %261 : vector<2x1xf32>
    %263 = arith.addf %259, %262 : vector<2x1xf32>
    %264 = vector.extract_strided_slice %244 {offsets = [0, 2], sizes = [2, 1], strides = [1, 1]} : vector<2x3xf32> to vector<2x1xf32>
    %265 = vector.extract_strided_slice %244 {offsets = [0, 2], sizes = [2, 1], strides = [1, 1]} : vector<2x3xf32> to vector<2x1xf32>
    %266 = arith.mulf %264, %265 : vector<2x1xf32>
    %267 = arith.addf %263, %266 : vector<2x1xf32>
    %268 = math.sqrt %267 : vector<2x1xf32>
    %269 = vector.extract_strided_slice %243 {offsets = [0, 0], sizes = [2, 1], strides = [1, 1]} : vector<2x3xf32> to vector<2x1xf32>
    %270 = vector.extract_strided_slice %244 {offsets = [0, 0], sizes = [2, 1], strides = [1, 1]} : vector<2x3xf32> to vector<2x1xf32>
    %271 = arith.mulf %269, %270 : vector<2x1xf32>
    %272 = vector.extract_strided_slice %243 {offsets = [0, 1], sizes = [2, 1], strides = [1, 1]} : vector<2x3xf32> to vector<2x1xf32>
    %273 = vector.extract_strided_slice %244 {offsets = [0, 1], sizes = [2, 1], strides = [1, 1]} : vector<2x3xf32> to vector<2x1xf32>
    %274 = arith.mulf %272, %273 : vector<2x1xf32>
    %275 = arith.addf %271, %274 : vector<2x1xf32>
    %276 = vector.extract_strided_slice %243 {offsets = [0, 2], sizes = [2, 1], strides = [1, 1]} : vector<2x3xf32> to vector<2x1xf32>
    %277 = vector.extract_strided_slice %244 {offsets = [0, 2], sizes = [2, 1], strides = [1, 1]} : vector<2x3xf32> to vector<2x1xf32>
    %278 = arith.mulf %276, %277 : vector<2x1xf32>
    %279 = arith.addf %275, %278 : vector<2x1xf32>
    %cst_42 = arith.constant 9.99999993E-9 : f32
    %280 = vector.broadcast %cst_42 : f32 to vector<2x1xf32>
    %281 = arith.maximumf %256, %280 : vector<2x1xf32>
    %cst_43 = arith.constant 9.99999993E-9 : f32
    %282 = vector.broadcast %cst_43 : f32 to vector<2x1xf32>
    %283 = arith.maximumf %268, %282 : vector<2x1xf32>
    %284 = arith.mulf %281, %283 : vector<2x1xf32>
    %285 = arith.divf %279, %284 : vector<2x1xf32>
    %cst_44 = arith.constant dense<0.000000e+00> : vector<2xf32>
    %286 = vector.multi_reduction <add>, %285, %cst_44 [1] : vector<2x1xf32> to vector<2xf32>
    %287 = vector.shape_cast %286 : vector<2xf32> to vector<2x1xf32>
    %cst_45 = arith.constant dense<0.000000e+00> : vector<1xf32>
    %288 = vector.multi_reduction <add>, %287, %cst_45 [0] : vector<2x1xf32> to vector<1xf32>
    %289 = vector.shape_cast %288 : vector<1xf32> to vector<1x1xf32>
    %cst_46 = arith.constant 2.000000e+00 : f32
    %290 = vector.broadcast %cst_46 : f32 to vector<1x1xf32>
    %291 = arith.divf %289, %290 : vector<1x1xf32>
    %cst_47 = arith.constant 1.000000e+00 : f32
    %292 = vector.broadcast %cst_47 : f32 to vector<1x1xf32>
    %293 = arith.subf %292, %291 : vector<1x1xf32>
    %294 = vector.broadcast %268 : vector<2x1xf32> to vector<2x3xf32>
    %295 = arith.divf %244, %294 : vector<2x3xf32>
    %296 = vector.extract_strided_slice %137 {offsets = [0, 3], sizes = [2, 3], strides = [1, 1]} : vector<2x6xf32> to vector<2x3xf32>
    %297 = vector.extract_strided_slice %136 {offsets = [0, 3], sizes = [2, 3], strides = [1, 1]} : vector<2x6xf32> to vector<2x3xf32>
    %298 = arith.addf %296, %295 : vector<2x3xf32>
    %299 = arith.subf %296, %298 : vector<2x3xf32>
    %300 = arith.subf %297, %298 : vector<2x3xf32>
    %301 = vector.extract_strided_slice %300 {offsets = [0, 0], sizes = [2, 1], strides = [1, 1]} : vector<2x3xf32> to vector<2x1xf32>
    %302 = vector.extract_strided_slice %299 {offsets = [0, 0], sizes = [2, 1], strides = [1, 1]} : vector<2x3xf32> to vector<2x1xf32>
    %303 = arith.mulf %301, %302 : vector<2x1xf32>
    %304 = vector.extract_strided_slice %300 {offsets = [0, 1], sizes = [2, 1], strides = [1, 1]} : vector<2x3xf32> to vector<2x1xf32>
    %305 = vector.extract_strided_slice %299 {offsets = [0, 1], sizes = [2, 1], strides = [1, 1]} : vector<2x3xf32> to vector<2x1xf32>
    %306 = arith.mulf %304, %305 : vector<2x1xf32>
    %307 = arith.addf %303, %306 : vector<2x1xf32>
    %308 = vector.extract_strided_slice %300 {offsets = [0, 2], sizes = [2, 1], strides = [1, 1]} : vector<2x3xf32> to vector<2x1xf32>
    %309 = vector.extract_strided_slice %299 {offsets = [0, 2], sizes = [2, 1], strides = [1, 1]} : vector<2x3xf32> to vector<2x1xf32>
    %310 = arith.mulf %308, %309 : vector<2x1xf32>
    %311 = arith.addf %307, %310 : vector<2x1xf32>
    %312 = vector.extract_strided_slice %299 {offsets = [0, 0], sizes = [2, 1], strides = [1, 1]} : vector<2x3xf32> to vector<2x1xf32>
    %313 = vector.extract_strided_slice %299 {offsets = [0, 0], sizes = [2, 1], strides = [1, 1]} : vector<2x3xf32> to vector<2x1xf32>
    %314 = arith.mulf %312, %313 : vector<2x1xf32>
    %315 = vector.extract_strided_slice %299 {offsets = [0, 1], sizes = [2, 1], strides = [1, 1]} : vector<2x3xf32> to vector<2x1xf32>
    %316 = vector.extract_strided_slice %299 {offsets = [0, 1], sizes = [2, 1], strides = [1, 1]} : vector<2x3xf32> to vector<2x1xf32>
    %317 = arith.mulf %315, %316 : vector<2x1xf32>
    %318 = arith.addf %314, %317 : vector<2x1xf32>
    %319 = vector.extract_strided_slice %299 {offsets = [0, 2], sizes = [2, 1], strides = [1, 1]} : vector<2x3xf32> to vector<2x1xf32>
    %320 = vector.extract_strided_slice %299 {offsets = [0, 2], sizes = [2, 1], strides = [1, 1]} : vector<2x3xf32> to vector<2x1xf32>
    %321 = arith.mulf %319, %320 : vector<2x1xf32>
    %322 = arith.addf %318, %321 : vector<2x1xf32>
    %323 = arith.divf %311, %322 : vector<2x1xf32>
    %324 = arith.subf %296, %298 : vector<2x3xf32>
    %325 = vector.broadcast %323 : vector<2x1xf32> to vector<2x3xf32>
    %326 = arith.mulf %325, %324 : vector<2x3xf32>
    %327 = arith.subf %298, %297 : vector<2x3xf32>
    %328 = arith.addf %326, %327 : vector<2x3xf32>
    %329 = vector.extract_strided_slice %328 {offsets = [0, 0], sizes = [2, 1], strides = [1, 1]} : vector<2x3xf32> to vector<2x1xf32>
    %330 = vector.extract_strided_slice %328 {offsets = [0, 0], sizes = [2, 1], strides = [1, 1]} : vector<2x3xf32> to vector<2x1xf32>
    %331 = arith.mulf %329, %330 : vector<2x1xf32>
    %332 = vector.extract_strided_slice %328 {offsets = [0, 1], sizes = [2, 1], strides = [1, 1]} : vector<2x3xf32> to vector<2x1xf32>
    %333 = vector.extract_strided_slice %328 {offsets = [0, 1], sizes = [2, 1], strides = [1, 1]} : vector<2x3xf32> to vector<2x1xf32>
    %334 = arith.mulf %332, %333 : vector<2x1xf32>
    %335 = arith.addf %331, %334 : vector<2x1xf32>
    %336 = vector.extract_strided_slice %328 {offsets = [0, 2], sizes = [2, 1], strides = [1, 1]} : vector<2x3xf32> to vector<2x1xf32>
    %337 = vector.extract_strided_slice %328 {offsets = [0, 2], sizes = [2, 1], strides = [1, 1]} : vector<2x3xf32> to vector<2x1xf32>
    %338 = arith.mulf %336, %337 : vector<2x1xf32>
    %339 = arith.addf %335, %338 : vector<2x1xf32>
    %340 = math.sqrt %339 : vector<2x1xf32>
    %cst_48 = arith.constant dense<0.000000e+00> : vector<2xf32>
    %341 = vector.multi_reduction <add>, %340, %cst_48 [1] : vector<2x1xf32> to vector<2xf32>
    %342 = vector.shape_cast %341 : vector<2xf32> to vector<2x1xf32>
    %cst_49 = arith.constant dense<0.000000e+00> : vector<1xf32>
    %343 = vector.multi_reduction <add>, %342, %cst_49 [0] : vector<2x1xf32> to vector<1xf32>
    %344 = vector.shape_cast %343 : vector<1xf32> to vector<1x1xf32>
    %cst_50 = arith.constant 2.000000e+00 : f32
    %345 = vector.broadcast %cst_50 : f32 to vector<1x1xf32>
    %346 = arith.divf %344, %345 : vector<1x1xf32>
    %347 = arith.addf %346, %293 : vector<1x1xf32>
    %348 = arith.addf %242, %347 : vector<1x1xf32>
    %cst_51 = arith.constant 5.000000e-01 : f32
    %349 = vector.broadcast %cst_51 : f32 to vector<1x1xf32>
    %350 = arith.mulf %348, %349 : vector<1x1xf32>
    %351 = vector.extract_strided_slice %67 {offsets = [0, 42], sizes = [2, 10], strides = [1, 1]} : vector<2x52xf32> to vector<2x10xf32>
    %352 = arith.mulf %351, %351 : vector<2x10xf32>
    %cst_52 = arith.constant dense<0.000000e+00> : vector<2xf32>
    %353 = vector.multi_reduction <add>, %352, %cst_52 [1] : vector<2x10xf32> to vector<2xf32>
    %354 = vector.shape_cast %353 : vector<2xf32> to vector<2x1xf32>
    %cst_53 = arith.constant dense<0.000000e+00> : vector<1xf32>
    %355 = vector.multi_reduction <add>, %354, %cst_53 [0] : vector<2x1xf32> to vector<1xf32>
    %356 = vector.shape_cast %355 : vector<1xf32> to vector<1x1xf32>
    %cst_54 = arith.constant 2.000000e+01 : f32
    %357 = vector.broadcast %cst_54 : f32 to vector<1x1xf32>
    %358 = arith.divf %356, %357 : vector<1x1xf32>
    %cst_55 = arith.constant 5.000000e+00 : f32
    %359 = vector.broadcast %cst_55 : f32 to vector<1x1xf32>
    %360 = arith.mulf %359, %20 : vector<1x1xf32>
    %cst_56 = arith.constant 3.000000e+00 : f32
    %361 = vector.broadcast %cst_56 : f32 to vector<1x1xf32>
    %362 = arith.mulf %361, %23 : vector<1x1xf32>
    %363 = arith.addf %360, %362 : vector<1x1xf32>
    %cst_57 = arith.constant 2.000000e-01 : f32
    %364 = vector.broadcast %cst_57 : f32 to vector<1x1xf32>
    %365 = arith.mulf %364, %116 : vector<1x1xf32>
    %366 = arith.addf %363, %365 : vector<1x1xf32>
    %cst_58 = arith.constant 5.000000e+00 : f32
    %367 = vector.broadcast %cst_58 : f32 to vector<1x1xf32>
    %368 = arith.mulf %367, %133 : vector<1x1xf32>
    %369 = arith.addf %366, %368 : vector<1x1xf32>
    %cst_59 = arith.constant 3.000000e+00 : f32
    %370 = vector.broadcast %cst_59 : f32 to vector<1x1xf32>
    %371 = arith.mulf %370, %350 : vector<1x1xf32>
    %372 = arith.addf %369, %371 : vector<1x1xf32>
    %cst_60 = arith.constant 1.000000e+00 : f32
    %373 = vector.broadcast %cst_60 : f32 to vector<1x1xf32>
    %374 = arith.mulf %373, %66 : vector<1x1xf32>
    %375 = arith.addf %372, %374 : vector<1x1xf32>
    %cst_61 = arith.constant 0.00999999977 : f32
    %376 = vector.broadcast %cst_61 : f32 to vector<1x1xf32>
    %377 = arith.mulf %376, %358 : vector<1x1xf32>
    %378 = arith.addf %375, %377 : vector<1x1xf32>
    %379 = tpu.iota {dimensions = array<i32: 1>} : vector<1x128xi32>
    %cst_62 = arith.constant 0.000000e+00 : f32
    %380 = vector.broadcast %cst_62 : f32 to vector<1x128xf32>
    %c0_i32 = arith.constant 0 : i32
    %381 = vector.broadcast %c0_i32 : i32 to vector<1x128xi32>
    %382 = arith.cmpi eq, %379, %381 : vector<1x128xi32>
    %383 = vector.shape_cast %378 : vector<1x1xf32> to vector<1x1xf32>
    %384 = vector.broadcast %383 : vector<1x1xf32> to vector<1x128xf32>
    %385 = arith.select %382, %384, %380 : vector<1x128xi1>, vector<1x128xf32>
    %c1_i32 = arith.constant 1 : i32
    %386 = vector.broadcast %c1_i32 : i32 to vector<1x128xi32>
    %387 = arith.cmpi eq, %379, %386 : vector<1x128xi32>
    %388 = vector.shape_cast %20 : vector<1x1xf32> to vector<1x1xf32>
    %389 = vector.broadcast %388 : vector<1x1xf32> to vector<1x128xf32>
    %390 = arith.select %387, %389, %385 : vector<1x128xi1>, vector<1x128xf32>
    %c2_i32 = arith.constant 2 : i32
    %391 = vector.broadcast %c2_i32 : i32 to vector<1x128xi32>
    %392 = arith.cmpi eq, %379, %391 : vector<1x128xi32>
    %393 = vector.shape_cast %23 : vector<1x1xf32> to vector<1x1xf32>
    %394 = vector.broadcast %393 : vector<1x1xf32> to vector<1x128xf32>
    %395 = arith.select %392, %394, %390 : vector<1x128xi1>, vector<1x128xf32>
    %c3_i32 = arith.constant 3 : i32
    %396 = vector.broadcast %c3_i32 : i32 to vector<1x128xi32>
    %397 = arith.cmpi eq, %379, %396 : vector<1x128xi32>
    %398 = vector.shape_cast %116 : vector<1x1xf32> to vector<1x1xf32>
    %399 = vector.broadcast %398 : vector<1x1xf32> to vector<1x128xf32>
    %400 = arith.select %397, %399, %395 : vector<1x128xi1>, vector<1x128xf32>
    %c4_i32 = arith.constant 4 : i32
    %401 = vector.broadcast %c4_i32 : i32 to vector<1x128xi32>
    %402 = arith.cmpi eq, %379, %401 : vector<1x128xi32>
    %403 = vector.shape_cast %133 : vector<1x1xf32> to vector<1x1xf32>
    %404 = vector.broadcast %403 : vector<1x1xf32> to vector<1x128xf32>
    %405 = arith.select %402, %404, %400 : vector<1x128xi1>, vector<1x128xf32>
    %c5_i32 = arith.constant 5 : i32
    %406 = vector.broadcast %c5_i32 : i32 to vector<1x128xi32>
    %407 = arith.cmpi eq, %379, %406 : vector<1x128xi32>
    %408 = vector.shape_cast %350 : vector<1x1xf32> to vector<1x1xf32>
    %409 = vector.broadcast %408 : vector<1x1xf32> to vector<1x128xf32>
    %410 = arith.select %407, %409, %405 : vector<1x128xi1>, vector<1x128xf32>
    %c6_i32 = arith.constant 6 : i32
    %411 = vector.broadcast %c6_i32 : i32 to vector<1x128xi32>
    %412 = arith.cmpi eq, %379, %411 : vector<1x128xi32>
    %413 = vector.shape_cast %66 : vector<1x1xf32> to vector<1x1xf32>
    %414 = vector.broadcast %413 : vector<1x1xf32> to vector<1x128xf32>
    %415 = arith.select %412, %414, %410 : vector<1x128xi1>, vector<1x128xf32>
    %c7_i32 = arith.constant 7 : i32
    %416 = vector.broadcast %c7_i32 : i32 to vector<1x128xi32>
    %417 = arith.cmpi eq, %379, %416 : vector<1x128xi32>
    %418 = vector.shape_cast %358 : vector<1x1xf32> to vector<1x1xf32>
    %419 = vector.broadcast %418 : vector<1x1xf32> to vector<1x128xf32>
    %420 = arith.select %417, %419, %415 : vector<1x128xi1>, vector<1x128xf32>
    %c0_63 = arith.constant 0 : index
    %c0_64 = arith.constant 0 : index
    %421 = vector.load %arg1[%c0_63, %c0_64] : memref<1x128xf32, #tpu.memory_space<vmem>>, vector<1x128xf32>
    tpu.vector_store %arg1[%c0_63, %c0_64], %420 {strides = array<i32>} : memref<1x128xf32, #tpu.memory_space<vmem>>, vector<1x128xf32>,
    return
  }
}

</mosaic_0001>

<bundles_post_ra>
// kernel: omad_loss_pallas.1
= control target key start
LH: loop header
LB: loop body
LE: loop exit
PB: predicated region body
PF: predicated region fallthrough
CT: control target
= control target key end

     0   :  { %v551_v1 = vmov 27   ;;  %s552_s8 = smov 127   ;;  %s553_s9 = smov 126   ;;  %v554_v12 = vmov 24   ;;  %v557_v32 = vmov 33   ;;  %v558_v40 = vmov 30   ;;  %s730_s0 = inlined_call_operand.vmem [shape: f32[34,128], index: 0, kind: input, shape index: {}]   ;;  %s731_s1 = inlined_call_operand.vmem [shape: f32[1,128], index: 1, kind: output, shape index: {}]  }
   0x1   :  { %v583_v0 = vld [vmem:[%s730_s0 + $0x20] sm:$0x3]  ;;  %515 = vset.pattern.permute.xlu1 %v551_v1  ;;  %s555_s10 = smov 12   ;;  %s556_s11 = smov 122   ;;  %518 = vset.pattern.permute.xlu0 %v558_v40  ;;  %vm325_vm2 = vcmask 173224   ;;  %vm224_vm3 = vcmask 148624  }
   0x2   :  { %v587_v2 = vmul.f32 %v583_v0, %v583_v0  ;;  %s559_s12 = smov 6   ;;  %s560_s13 = smov 125   ;;  %vm408_vm5 = vcmask 320824   ;;  %vm171_vm15 = vcmask 9216  }
   0x3   :  { %s561_s14 = smov 18   ;;  %s563_s15 = smov 124  }
   0x4   :  { %187 = vrot.lane.b32.xlu0 %v587_v2, %s552_s8  ;;  %s564_s16 = smov 114   ;;  %s565_s17 = smov 86  }
   0x5   :  { %s568_s26 = smov 92  }
   0x8   :  { %191 = vrot.lane.b32.xlu0 %v587_v2, %s553_s9 }
  0x76   :  { %v188_v3 = vpop.permute.xlu0 %187 }
  0x77   :  { %v190_v4 = vadd.f32 %v188_v3, %v587_v2 }
  0x7a   :  { %v192_v5 = vpop.permute.xlu0 %191 }
  0x7b   :  { %v194_v6 = vadd.f32 %v192_v5, %v190_v4 }
  0x7d   :  { %523 = vrsqrt.f32 %v194_v6  ;;  %vm197_vm0 = vcmp.eq.f32.partialorder %v194_v6, inf  ;;  %v200_v9 = vand.u32 2147483648, %v194_v6  ;;  %vm199_vm1 = vcmp.eq.f32.partialorder %v194_v6, 0.0 }
  0x87   :  { %v524_v7 = vpop.eup %523 }
  0x88   :  { %v196_v8 = vmul.f32 %v524_v7, %v194_v6 }
  0x8a   :  { %v198_v10 = vsel %vm197_vm0, %v194_v6, %v196_v8  ;;  %vm143_vm0 = vcmask 66624  }
  0x8b   :  { %v594_v11 = vsel %vm199_vm1, %v200_v9, %v198_v10 }
  0x8c   :  { %336 = vperm.xlu1 %515, %v594_v11   ;;  %v215_v54 = vmax.f32 %v594_v11, 1e-08 }
  0x90   :  { %516 = vset.pattern.permute.xlu1 %v554_v12 }
  0x91   :  { %236 = vperm.xlu1 %516, %v594_v11  }
  0x95   :  { %517 = vset.pattern.permute.xlu1 %v557_v32 }
 0x10b   :  { %v337_v13 = vpop.permute.xlu1 %336 }
 0x10c   :  { %525 = vrcp.f32 %v337_v13 }
 0x110   :  { %v237_v14 = vpop.permute.xlu1 %236 }
 0x111   :  { %527 = vrcp.f32 %v237_v14 }
 0x116   :  { %v526_v15 = vpop.eup %525 }
 0x117   :  { %v340_v16 = vmul.f32 %v526_v15, %v583_v0 }
 0x119   :  { %342 = vrot.lane.b32.xlu0 %v340_v16, %s555_s10 }
 0x11b   :  { %v528_v17 = vpop.eup %527 }
 0x11c   :  { %v240_v18 = vmul.f32 %v528_v17, %v583_v0 }
 0x11e   :  { %242 = vrot.lane.b32.xlu1 %v240_v18, %s555_s10 }
 0x18b   :  { %v343_v19 = vpop.permute.xlu0 %342 }
 0x18c   :  { %v601_v20 = vadd.f32 %v343_v19, %v583_v0 }
 0x18e   :  { %v605_v21 = vsub.f32 %v583_v0, %v601_v20 }
 0x190   :  { %v243_v22 = vpop.permute.xlu1 %242  ;;  %v366_v23 = vmul.f32 %v605_v21, %v605_v21 }
 0x191   :  { %v610_v24 = vadd.f32 %v243_v22, %v583_v0 }
 0x192   :  { %368 = vrot.lane.b32.xlu0 %v366_v23, %s552_s8  ;;  %372 = vrot.lane.b32.xlu1 %v366_v23, %s553_s9 }
 0x193   :  { %v616_v25 = vsub.f32 %v583_v0, %v610_v24 }
 0x195   :  { %v266_v26 = vmul.f32 %v616_v25, %v616_v25 }
 0x196   :  { %348 = vrot.lane.b32.xlu0 %v601_v20, %s556_s11  ;;  %353 = vrot.lane.b32.xlu1 %v605_v21, %s556_s11 }
 0x19a   :  { %272 = vrot.lane.b32.xlu1 %v266_v26, %s553_s9  ;;  %268 = vrot.lane.b32.xlu0 %v266_v26, %s552_s8 }
 0x19e   :  { %248 = vrot.lane.b32.xlu1 %v610_v24, %s556_s11 }
 0x204   :  { %v369_v27 = vpop.permute.xlu0 %368  ;;  %v373_v28 = vpop.permute.xlu1 %372 }
 0x205   :  { %v371_v29 = vadd.f32 %v369_v27, %v366_v23 }
 0x207   :  { %v375_v30 = vadd.f32 %v373_v28, %v371_v29 }
 0x208   :  { %v349_v31 = vpop.permute.xlu0 %348  ;;  %v354_v34 = vpop.permute.xlu1 %353 }
 0x209   :  { %v351_v33 = vsub.f32 %v583_v0, %v349_v31  ;;  %377 = vrot.lane.b32.xlu0 %v375_v30, %s556_s11 }
 0x20b   :  { %v356_v35 = vmul.f32 %v354_v34, %v351_v33 }
 0x20c   :  { %v269_v36 = vpop.permute.xlu0 %268  ;;  %v273_v38 = vpop.permute.xlu1 %272 }
 0x20d   :  { %253 = vrot.lane.b32.xlu0 %v616_v25, %s556_s11  ;;  %358 = vrot.lane.b32.xlu1 %v356_v35, %s552_s8  ;;  %v271_v37 = vadd.f32 %v269_v36, %v266_v26 }
 0x20f   :  { %v275_v39 = vadd.f32 %v273_v38, %v271_v37  ;;  %v562_v37 = vmov 1.0  }
 0x210   :  { %v249_v41 = vpop.permute.xlu1 %248 }
 0x211   :  { %362 = vrot.lane.b32.xlu0 %v356_v35, %s553_s9  ;;  %202 = vrot.lane.b32.xlu1 %v583_v0, %s556_s11  ;;  %v251_v43 = vsub.f32 %v583_v0, %v249_v41 }
 0x215   :  { %277 = vrot.lane.b32.xlu0 %v275_v39, %s556_s11 }
 0x27b   :  { %v378_v42 = vpop.permute.xlu0 %377 }
 0x27c   :  { %529 = vrcp.f32 %v378_v42 }
 0x27f   :  { %v254_v44 = vpop.permute.xlu0 %253  ;;  %v359_v45 = vpop.permute.xlu1 %358 }
 0x280   :  { %v256_v46 = vmul.f32 %v254_v44, %v251_v43  ;;  %v361_v47 = vadd.f32 %v359_v45, %v356_v35 }
 0x282   :  { %262 = vrot.lane.b32.xlu0 %v256_v46, %s553_s9  ;;  %258 = vrot.lane.b32.xlu1 %v256_v46, %s552_s8 }
 0x283   :  { %v363_v48 = vpop.permute.xlu0 %362  ;;  %v203_v49 = vpop.permute.xlu1 %202 }
 0x284   :  { %v365_v50 = vadd.f32 %v363_v48, %v361_v47  ;;  %v205_v52 = vmul.f32 %v203_v49, %v583_v0 }
 0x286   :  { %v530_v51 = vpop.eup %529  ;;  %288 = vrot.lane.b32.xlu0 %v583_v0, %s559_s12 }
 0x287   :  { %v381_v53 = vmul.f32 %v530_v51, %v365_v50  ;;  %v278_v55 = vpop.permute.xlu0 %277 }
 0x288   :  { %531 = vrcp.f32 %v278_v55 }
 0x289   :  { %384 = vperm.xlu1 %517, %v381_v53  }
 0x28a   :  { %207 = vrot.lane.b32.xlu0 %v205_v52, %s552_s8 }
 0x28d   :  { %217 = vrot.lane.b32.xlu1 %v215_v54, %s556_s11 }
 0x291   :  { %211 = vrot.lane.b32.xlu1 %v205_v52, %s553_s9 }
 0x292   :  { %v532_v60 = vpop.eup %531 }
 0x295   :  { %121 = vrot.lane.b32.xlu1 %v583_v0, %s560_s13 }
 0x299   :  { %158 = vrot.lane.b32.xlu1 %v583_v0, %s553_s9 }
 0x2f4   :  { %v259_v56 = vpop.permute.xlu1 %258  ;;  %v263_v58 = vpop.permute.xlu0 %262 }
 0x2f5   :  { %v261_v57 = vadd.f32 %v259_v56, %v256_v46 }
 0x2f7   :  { %v265_v59 = vadd.f32 %v263_v58, %v261_v57 }
 0x2f8   :  { %v289_v62 = vpop.permute.xlu0 %288 }
 0x2f9   :  { %v281_v61 = vmul.f32 %v532_v60, %v265_v59  ;;  %v388_v1 = vsub.f32 %v601_v20, %v289_v62  ;;  %v291_v39 = vsub.f32 %v610_v24, %v289_v62 }
 0x2fb   :  { %284 = vperm.xlu0 %518, %v281_v61  }
 0x2fc   :  { %v208_v9 = vpop.permute.xlu0 %207 }
 0x2fd   :  { %v210_v12 = vadd.f32 %v208_v9, %v205_v52  ;;  %v8_v9 = vld [vmem:[%s730_s0] sm:$0x7] }
 0x308   :  { %v385_v63 = vpop.permute.xlu1 %384 }
 0x309   :  { %v387_v3 = vmul.f32 %v385_v63, %v605_v21 }
 0x30b   :  { %v389_v4 = vadd.f32 %v388_v1, %v387_v3 }
 0x30c   :  { %v218_v5 = vpop.permute.xlu1 %217 }
 0x30d   :  { %v390_v6 = vmul.f32 %v389_v4, %v389_v4  ;;  %v220_v7 = vmul.f32 %v218_v5, %v215_v54 }
 0x30f   :  { %533 = vrcp.f32 %v220_v7  ;;  %392 = vrot.lane.b32.xlu0 %v390_v6, %s552_s8  ;;  %396 = vrot.lane.b32.xlu1 %v390_v6, %s553_s9 }
 0x310   :  { %v212_v8 = vpop.permute.xlu1 %211 }
 0x311   :  { %v214_v14 = vadd.f32 %v212_v8, %v210_v12 }
 0x314   :  { %v122_v10 = vpop.permute.xlu1 %121 }
 0x315   :  { %v124_v11 = vsub.f32 %v583_v0, %v122_v10  ;;  %v9_v10 = vld [vmem:[%s730_s0 + $0x8] sm:$0x7] }
 0x317   :  { %v655_v13 = vmul.f32 %v124_v11, %v124_v11 }
 0x318   :  { %v159_v31 = vpop.permute.xlu1 %158 }
 0x319   :  { %v534_v15 = vpop.eup %533  ;;  %127 = vrot.lane.b32.xlu1 %v655_v13, %s552_s8  ;;  %v162_v33 = vmul.f32 %v159_v31, %v583_v0  ;;  %v161_v35 = vsub.f32 %v583_v0, %v159_v31 }
 0x31a   :  { %v222_v16 = vmul.f32 %v534_v15, %v214_v14  ;;  %v10_v14 = vsub.f32 %v8_v9, %v9_v10 }
 0x31b   :  { %vm163_vm4 = vcmp.le.f32.partialorder %v162_v33, 0.0 }
 0x31c   :  { %v326_v17 = vsel %vm325_vm2, %v222_v16, 0.0  ;;  %v225_v28 = vsel %vm224_vm3, %v222_v16, 0.0  ;;  %v164_v38 = vsel %vm163_vm4, 20.0, %v562_v37  ;;  %vm30_vm2 = vcmask 778240  }
 0x31d   :  { %v327_v18 = vrot.slane %v326_v17, 4  ;;  %v226_v29 = vrot.slane %v225_v28, 4  ;;  %v165_v43 = vmul.f32 %v164_v38, %v161_v35  ;;  %vm85_vm3 = vcmask 1040384  }
 0x31f   :  { %v328_v19 = vadd.f32 %v327_v18, %v326_v17  ;;  %v227_v30 = vadd.f32 %v226_v29, %v225_v28  ;;  %v166_v47 = vand.u32 2147483647, %v165_v43  ;;  %v11_v18 = vmul.f32 %v10_v14, %v10_v14 }
 0x321   :  { %v329_v20 = vrot.slane %v328_v19, 2  ;;  %v228_v32 = vrot.slane %v227_v30, 2 }
 0x323   :  { %v330_v21 = vadd.f32 %v329_v20, %v328_v19  ;;  %v229_v34 = vadd.f32 %v228_v32, %v227_v30 }
 0x325   :  { %v331_v22 = vrot.slane %v330_v21, 1  ;;  %v230_v41 = vrot.slane %v229_v34, 1 }
 0x327   :  { %v332_v23 = vadd.f32 %v331_v22, %v330_v21  ;;  %v231_v45 = vadd.f32 %v230_v41, %v229_v34  ;;  %v13_v21 = vrot.slane %v11_v18, 1 }
 0x329   :  { %v333_v26 = vmul.f32 0.5, %v332_v23  ;;  %v232_v50 = vmul.f32 0.5, %v231_v45  ;;  %v15_v22 = vadd.f32 %v13_v21, %v11_v18  ;;  %v16_v23 = vrot.slane %v11_v18, 2 }
 0x32b   :  { %v334_v27 = vsub.f32 1.0, %v333_v26  ;;  %v18_v28 = vadd.f32 %v16_v23, %v15_v22 }
 0x32d   :  { %418 = vrot.lane.b32.xlu0 %v334_v27, %s561_s14  ;;  %vm21_vm8 = vcmp.eq.f32.partialorder %v18_v28, inf  ;;  %vm23_vm9 = vcmp.eq.f32.partialorder %v18_v28, 0.0 }
 0x331   :  { %131 = vrot.lane.b32.xlu0 %v655_v13, %s553_s9 }
 0x37a   :  { %v285_v36 = vpop.permute.xlu0 %284 }
 0x37b   :  { %v287_v40 = vmul.f32 %v285_v36, %v616_v25  ;;  %v233_v25 = vsub.f32 1.0, %v232_v50 }
 0x37d   :  { %v292_v42 = vadd.f32 %v291_v39, %v287_v40  ;;  %v26_v40 = vlaneseq }
 0x37f   :  { %v666_v44 = vmul.f32 %v292_v42, %v292_v42  ;;  %v41_v42 = vld [vmem:[%s730_s0 + $0x18] sm:$0x1]  ;;  %v704_v45 = vand.u32 127, %v26_v40 }
 0x380   :  { %vm53_vm10 = vcmp.eq.f32.partialorder %v41_v42, 0.0  ;;  %vm66_vm11 = vcmp.eq.f32.partialorder %v41_v42, 1.0  ;;  %vm78_vm14 = vcmp.eq.f32.partialorder %v41_v42, 2.0 }
 0x381   :  { %v393_v46 = vpop.permute.xlu0 %392  ;;  %299 = vrot.lane.b32.xlu0 %v666_v44, %s553_s9  ;;  %295 = vrot.lane.b32.xlu1 %v666_v44, %s552_s8  ;;  %v397_v49 = vpop.permute.xlu1 %396  ;;  %vm28_vm13 = vcmp.lt.s32.totalorder %v704_v45, 48 }
 0x382   :  { %v395_v48 = vadd.f32 %v393_v46, %v390_v6 }
 0x384   :  { %v399_v24 = vadd.f32 %v397_v49, %v395_v48 }
 0x385   :  { %92 = vrot.lane.b32.xlu0 %v583_v0, %s563_s15  ;;  %168 = vrot.lane.b32.xlu1 %v166_v47, %s564_s16 }
 0x386   :  { %535 = vrsqrt.f32 %v399_v24  ;;  %vm402_vm6 = vcmp.eq.f32.partialorder %v399_v24, inf  ;;  %v405_v53 = vand.u32 2147483648, %v399_v24  ;;  %vm404_vm7 = vcmp.eq.f32.partialorder %v399_v24, 0.0 }
 0x389   :  { %321 = vrot.lane.b32.xlu0 %v233_v25, %s561_s14  ;;  %428 = vrot.lane.b32.xlu1 %v587_v2, %s565_s17  ;;  %v679_v2 = vld [vmem:[%s730_s0 + $0x10] sm:$0x7]  ;;  %s567_s0 = smov 120  }
 0x38a   :  { %v43_v4 = vrot.slane %v679_v2, 1  ;;  %v46_v6 = vrot.slane %v679_v2, 2 }
 0x38b   :  { %v128_v27 = vpop.permute.xlu1 %127 }
 0x38c   :  { %v45_v5 = vmax.f32 %v679_v2, %v43_v4  ;;  %v130_v31 = vadd.f32 %v128_v27, %v655_v13  ;;  %v24_v13 = vand.u32 2147483648, %v18_v28  ;;  %v67_v25 = vsel %vm66_vm11, %v43_v4, 0.0 }
 0x38d   :  { %v566_v27 = vmov 0   ;;  %vm467_vm11 = vcmp.eq.s32.totalorder %v704_v45, 1 }
 0x38e   :  { %v686_v7 = vmax.f32 %v45_v5, %v46_v6  ;;  %520 = vset.pattern.permute.xlu1 %v566_v27  ;;  %519 = vset.pattern.permute.xlu0 %v566_v27 }
 0x390   :  { %v536_v51 = vpop.eup %535  ;;  %v57_v8 = vrot.slane %v686_v7, 7  ;;  %v69_v12 = vrot.slane %v686_v7, 6  ;;  %v49_v15 = vsub.f32 %v679_v2, %v686_v7 }
 0x391   :  { %v401_v52 = vmul.f32 %v536_v51, %v399_v24 }
 0x392   :  { %v59_v11 = vsub.f32 %v679_v2, %v57_v8  ;;  %v71_v17 = vsub.f32 %v679_v2, %v69_v12  ;;  %v50_v19 = vmul.f32 1.442695, %v49_v15 }
 0x393   :  { %v403_v54 = vsel %vm402_vm6, %v399_v24, %v401_v52  ;;  %v54_v24 = vsel %vm53_vm10, %v679_v2, 0.0  ;;  %vm311_vm6 = vcmask 296224   ;;  %vm460_vm10 = vcmp.eq.s32.totalorder %v704_v45, 0 }
 0x394   :  { %v406_v55 = vsel %vm404_vm7, %v405_v53, %v403_v54  ;;  %v60_v16 = vmul.f32 1.442695, %v59_v11  ;;  %v72_v20 = vmul.f32 1.442695, %v71_v17  ;;  %vm431_vm7 = vcmask 74752  }
 0x395   :  { %v409_v56 = vsel %vm408_vm5, %v406_v55, 0.0  ;;  %v68_v55 = vadd.f32 %v67_v25, %v54_v24 }
 0x396   :  { %v410_v57 = vrot.slane %v409_v56, 4  ;;  %537 = vpow2.f32 %v60_v16 }
 0x397   :  { %539 = vpow2.f32 %v50_v19 }
 0x398   :  { %v411_v58 = vadd.f32 %v410_v57, %v409_v56  ;;  %541 = vpow2.f32 %v72_v20 }
 0x399   :  { %543 = vrsqrt.f32 %v18_v28 }
 0x39a   :  { %v412_v59 = vrot.slane %v411_v58, 2 }
 0x39c   :  { %v413_v60 = vadd.f32 %v412_v59, %v411_v58 }
 0x39e   :  { %v414_v61 = vrot.slane %v413_v60, 1 }
 0x39f   :  { %v419_v1 = vpop.permute.xlu0 %418 }
 0x3a0   :  { %v415_v62 = vadd.f32 %v414_v61, %v413_v60  ;;  %v538_v26 = vpop.eup %537  ;;  %v79_v60 = vsel %vm78_vm14, %v46_v6, 0.0  ;;  %vm478_vm14 = vcmp.eq.s32.totalorder %v704_v45, 4 }
 0x3a1   :  { %v540_v30 = vpop.eup %539  ;;  %v63_v32 = vrot.slane %v538_v26, 1 }
 0x3a2   :  { %v416_v63 = vmul.f32 0.5, %v415_v62  ;;  %v542_v33 = vpop.eup %541 }
 0x3a3   :  { %v132_v29 = vpop.permute.xlu0 %131  ;;  %v65_v35 = vadd.f32 %v540_v30, %v63_v32  ;;  %v75_v36 = vrot.slane %v542_v33, 2  ;;  %v544_v38 = vpop.eup %543 }
 0x3a4   :  { %v421_v3 = vadd.f32 %v419_v1, %v416_v63  ;;  %v134_v34 = vadd.f32 %v132_v29, %v130_v31  ;;  %v20_v39 = vmul.f32 %v544_v38, %v18_v28  ;;  %v80_v1 = vadd.f32 %v79_v60, %v68_v55 }
 0x3a5   :  { %v77_v37 = vadd.f32 %v75_v36, %v65_v35 }
 0x3a6   :  { %423 = vrot.lane.b32.xlu1 %v421_v3, %s560_s13  ;;  %545 = vrsqrt.f32 %v134_v34  ;;  %v22_v43 = vsel %vm21_vm8, %v18_v28, %v20_v39  ;;  %vm137_vm12 = vcmp.eq.f32.partialorder %v134_v34, inf  ;;  %v140_v53 = vand.u32 2147483648, %v134_v34 }
 0x3a7   :  { %547 = vlog2.f32 %v77_v37  ;;  %v25_v50 = vsel %vm23_vm9, %v24_v13, %v22_v43  ;;  %vm139_vm1 = vcmp.eq.f32.partialorder %v134_v34, 0.0  ;;  %vm111_vm8 = vcmask 1024  }
 0x3a8   :  { %v29_v59 = vsel %vm28_vm13, %v25_v50, 0.0  ;;  %v34_v2 = vsel %vm30_vm2, %v25_v50, 0.0  ;;  %vm175_vm9 = vcmask 1041408   ;;  %vm471_vm13 = vcmp.eq.s32.totalorder %v704_v45, 3 }
 0x3a9   :  { %v31_v63 = vsel %vm30_vm2, %v29_v59, 0.0 }
 0x3b0   :  { %v546_v41 = vpop.eup %545 }
 0x3b1   :  { %v136_v46 = vmul.f32 %v546_v41, %v134_v34  ;;  %v548_v47 = vpop.eup %547 }
 0x3b2   :  { %v82_v56 = vmul.f32 0.6931472, %v548_v47 }
 0x3b3   :  { %v138_v52 = vsel %vm137_vm12, %v134_v34, %v136_v46  ;;  %vm469_vm12 = vcmp.eq.s32.totalorder %v704_v45, 2 }
 0x3b4   :  { %v141_v61 = vsel %vm139_vm1, %v140_v53, %v138_v52  ;;  %v83_v3 = vadd.f32 %v82_v56, %v686_v7  ;;  %vm489_vm1 = vcmp.eq.s32.totalorder %v704_v45, 7 }
 0x3b5   :  { %v144_v4 = vsel %vm143_vm0, %v141_v61, 0.0  ;;  %v569_v61 = vmov 36   ;;  %vm487_vm0 = vcmp.eq.s32.totalorder %v704_v45, 6 }
 0x3b6   :  { %v145_v5 = vrot.slane %v144_v4, 4  ;;  %v84_v6 = vsub.f32 %v83_v3, %v80_v1 }
 0x3b8   :  { %v146_v8 = vadd.f32 %v145_v5, %v144_v4  ;;  %v86_v9 = vsel %vm85_vm3, %v84_v6, 0.0 }
 0x3ba   :  { %v147_v7 = vrot.slane %v146_v8, 2 }
 0x3bc   :  { %v148_v15 = vadd.f32 %v147_v7, %v146_v8 }
 0x3be   :  { %v149_v18 = vrot.slane %v148_v15, 1 }
 0x3c0   :  { %v150_v20 = vadd.f32 %v149_v18, %v148_v15 }
 0x3c2   :  { %v151_v22 = vmul.f32 0.5, %v150_v20 }
 0x3c4   :  { %v152_v26 = vmul.f32 0.5, %v151_v22 }
 0x3f3   :  { %v300_v48 = vpop.permute.xlu0 %299  ;;  %v296_v49 = vpop.permute.xlu1 %295 }
 0x3f4   :  { %v298_v51 = vadd.f32 %v296_v49, %v666_v44 }
 0x3f6   :  { %v302_v54 = vadd.f32 %v300_v48, %v298_v51 }
 0x3f7   :  { %v93_v57 = vpop.permute.xlu0 %92  ;;  %v169_v58 = vpop.permute.xlu1 %168 }
 0x3f8   :  { %549 = vrsqrt.f32 %v302_v54  ;;  %v95_v44 = vmul.f32 %v93_v57, %v583_v0  ;;  %v172_v62 = vsel %vm171_vm15, %v169_v58, 0.0  ;;  %vm305_vm4 = vcmp.eq.f32.partialorder %v302_v54, inf }
 0x3f9   :  { %173 = vadd.xlane.f32.xlu0 %v172_v62  ;;  %v308_v12 = vand.u32 2147483648, %v302_v54  ;;  %vm307_vm5 = vcmp.eq.f32.partialorder %v302_v54, 0.0  ;;  %vm480_vm15 = vcmp.eq.s32.totalorder %v704_v45, 5 }
 0x3fa   :  { %97 = vrot.lane.b32.xlu1 %v95_v44, %s552_s8 }
 0x3fb   :  { %v429_v30 = vpop.permute.xlu1 %428  ;;  %v322_v33 = vpop.permute.xlu0 %321 }
 0x3fc   :  { %v432_v31 = vsel %vm431_vm7, %v429_v30, 0.0 }
 0x3fd   :  { %32 = vadd.xlane.f32.xlu0 %v31_v63 }
 0x3fe   :  { %101 = vrot.lane.b32.xlu1 %v95_v44, %s553_s9 }
 0x401   :  { %35 = vadd.xlane.f32.xlu0 %v34_v2 }
 0x402   :  { %v550_v0 = vpop.eup %549  ;;  %105 = vrot.lane.b32.xlu1 %v95_v44, %s560_s13 }
 0x403   :  { %v304_v10 = vmul.f32 %v550_v0, %v302_v54 }
 0x405   :  { %v306_v11 = vsel %vm305_vm4, %v302_v54, %v304_v10  ;;  %87 = vadd.xlane.f32.xlu0 %v86_v9 }
 0x406   :  { %v309_v14 = vsel %vm307_vm5, %v308_v12, %v306_v11 }
 0x407   :  { %v312_v16 = vsel %vm311_vm6, %v309_v14, 0.0 }
 0x408   :  { %v313_v17 = vrot.slane %v312_v16, 4 }
 0x40a   :  { %v314_v19 = vadd.f32 %v313_v17, %v312_v16 }
 0x40c   :  { %v315_v21 = vrot.slane %v314_v19, 2 }
 0x40e   :  { %v316_v23 = vadd.f32 %v315_v21, %v314_v19 }
 0x410   :  { %v317_v28 = vrot.slane %v316_v23, 1 }
 0x412   :  { %v318_v29 = vadd.f32 %v317_v28, %v316_v23 }
 0x414   :  { %v319_v32 = vmul.f32 0.5, %v318_v29 }
 0x416   :  { %v324_v34 = vadd.f32 %v322_v33, %v319_v32 }
 0x418   :  { %v424_v35 = vpop.permute.xlu1 %423 }
 0x419   :  { %v426_v36 = vadd.f32 %v424_v35, %v324_v34 }
 0x41b   :  { %154 = vrot.lane.b32.xlu0 %v152_v26, %s567_s0  ;;  %v427_v37 = vmul.f32 0.5, %v426_v36 }
 0x41d   :  { %v451_v38 = vmul.f32 3.0, %v427_v37 }
 0x426   :  { %433 = vadd.xlane.f32.xlu1 %v432_v31 }
 0x437   :  { %453 = vrot.lane.b32.xlu1 %v451_v38, %s568_s26 }
 0x46c   :  { %v98_v39 = vpop.permute.xlu1 %97 }
 0x46d   :  { %v100_v41 = vadd.f32 %v98_v39, %v95_v44 }
 0x470   :  { %v102_v40 = vpop.permute.xlu1 %101 }
 0x471   :  { %v104_v42 = vadd.f32 %v102_v40, %v100_v41 }
 0x474   :  { %v106_v43 = vpop.permute.xlu1 %105 }
 0x475   :  { %v108_v13 = vadd.f32 %v106_v43, %v104_v42 }
 0x477   :  { %v109_v46 = vsub.f32 1.0, %v108_v13 }
 0x479   :  { %v112_v47 = vsel %vm111_vm8, %v109_v46, 0.0 }
 0x47a   :  { %v113_v48 = vrot.slane %v112_v47, 4 }
 0x47c   :  { %v114_v49 = vadd.f32 %v113_v48, %v112_v47 }
 0x47e   :  { %v115_v50 = vrot.slane %v114_v49, 2 }
 0x480   :  { %v116_v25 = vadd.f32 %v115_v50, %v114_v49 }
 0x482   :  { %v117_v52 = vrot.slane %v116_v25, 1 }
 0x484   :  { %v118_v54 = vadd.f32 %v117_v52, %v116_v25 }
 0x486   :  { %v174_v24 = vpop.xlane.xlu0 %173  ;;  %v120_v56 = vmul.f32 0.5, %v118_v54 }
 0x487   :  { %v176_v59 = vsel %vm175_vm9, %v174_v24, 0.0 }
 0x488   :  { %v177_v60 = vrot.slane %v176_v59, 4 }
 0x48a   :  { %v33_v51 = vpop.xlane.xlu0 %32  ;;  %v178_v44 = vadd.f32 %v177_v60, %v176_v59 }
 0x48b   :  { %v37_v4 = vmul.f32 0.020833334, %v33_v51 }
 0x48c   :  { %v179_v62 = vrot.slane %v178_v44, 2 }
 0x48d   :  { %v444_v6 = vmul.f32 5.0, %v37_v4 }
 0x48e   :  { %v36_v53 = vpop.xlane.xlu0 %35  ;;  %v180_v63 = vadd.f32 %v179_v62, %v178_v44 }
 0x48f   :  { %v38_v1 = vsub.f32 %v36_v53, %v33_v51 }
 0x490   :  { %v181_v3 = vrot.slane %v180_v63, 1 }
 0x491   :  { %v39_v5 = vmul.f32 0.020833334, %v38_v1 }
 0x492   :  { %v88_v55 = vpop.xlane.xlu0 %87  ;;  %v182_v2 = vadd.f32 %v181_v3, %v180_v63 }
 0x493   :  { %v445_v8 = vmul.f32 3.0, %v39_v5  ;;  %v89_v26 = vmul.f32 0.0078125, %v88_v55 }
 0x494   :  { %v184_v10 = vmul.f32 0.25, %v182_v2 }
 0x495   :  { %v446_v11 = vadd.f32 %v445_v8, %v444_v6 }
 0x496   :  { %v155_v57 = vpop.permute.xlu0 %154  ;;  %v449_v16 = vmul.f32 5.0, %v184_v10 }
 0x497   :  { %v157_v58 = vadd.f32 %v155_v57, %v120_v56 }
 0x499   :  { %474 = vperm.xlu1 %520, %v157_v58   ;;  %v447_v12 = vmul.f32 0.2, %v157_v58 }
 0x49b   :  { %v448_v17 = vadd.f32 %v447_v12, %v446_v11 }
 0x49d   :  { %521 = vset.pattern.permute.xlu1 %v569_v61  ;;  %v450_v21 = vadd.f32 %v449_v16, %v448_v17 }
 0x49e   :  { %483 = vperm.xlu1 %521, %v427_v37  }
 0x4b3   :  { %v434_v0 = vpop.xlane.xlu1 %433 }
 0x4b4   :  { %v435_v9 = vsel %vm175_vm9, %v434_v0, 0.0 }
 0x4b5   :  { %v436_v7 = vrot.slane %v435_v9, 4 }
 0x4b7   :  { %v437_v14 = vadd.f32 %v436_v7, %v435_v9  ;;  %v454_v19 = vpop.permute.xlu1 %453 }
 0x4b8   :  { %v456_v23 = vadd.f32 %v454_v19, %v450_v21 }
 0x4b9   :  { %v438_v15 = vrot.slane %v437_v14, 2 }
 0x4ba   :  { %v457_v28 = vadd.f32 %v456_v23, %v89_v26 }
 0x4bb   :  { %v439_v18 = vadd.f32 %v438_v15, %v437_v14 }
 0x4bd   :  { %v440_v20 = vrot.slane %v439_v18, 1 }
 0x4bf   :  { %v441_v22 = vadd.f32 %v440_v20, %v439_v18 }
 0x4c1   :  { %v443_v27 = vmul.f32 0.05, %v441_v22 }
 0x4c3   :  { %v458_v29 = vmul.f32 0.01, %v443_v27 }
 0x4c5   :  { %v459_v30 = vadd.f32 %v458_v29, %v457_v28 }
 0x4c7   :  { %463 = vperm.xlu0 %519, %v459_v30  }
 0x4cb   :  { %522 = vset.pattern.permute.xlu0 %v569_v61 }
 0x518   :  { %v475_v31 = vpop.permute.xlu1 %474 }
 0x51d   :  { %v484_v37 = vpop.permute.xlu1 %483 }
 0x546   :  { %v464_v32 = vpop.permute.xlu0 %463 }
 0x547   :  { %v466_v33 = vsel %vm460_vm10, %v464_v32, 0.0 }
 0x548   :  { %v468_v34 = vsel %vm467_vm11, %v37_v4, %v466_v33 }
 0x549   :  { %v470_v35 = vsel %vm469_vm12, %v39_v5, %v468_v34 }
 0x54a   :  { %v477_v36 = vsel %vm471_vm13, %v475_v31, %v470_v35 }
 0x54b   :  { %v479_v38 = vsel %vm478_vm14, %v184_v10, %v477_v36 }
 0x54c   :  { %v486_v39 = vsel %vm480_vm15, %v484_v37, %v479_v38 }
 0x54d   :  { %v488_v40 = vsel %vm487_vm0, %v89_v26, %v486_v39 }
 0x54e   :  { %v490_v41 = vsel %vm489_vm1, %v443_v27, %v488_v40 }
 0x54f   :  { %491 = vst [vmem:[%s731_s1] sm:$0x1] %v490_v41 }

</bundles_post_ra>
